<compile_context>
chip_gen: v6e
topology: v6e:2x2x1
jax: 0.10.0
libtpu: 0.0.40
codegen_flags: <defaults>
</compile_context>

<pallas_src>
import jax
import jax.numpy as jnp
from jax.experimental import pallas as pl
from jax.experimental.pallas import tpu as pltpu

_EPS = 1e-5
_HI = jax.lax.Precision.HIGHEST  # only for tiny wrapper-side weight folding + reference


# --------------------------------------------------------------------------
# Fused kernel: conv3x3 -> conv3x3 -> BN+ReLU -> deconv2x2s2 -> BN+ReLU
# --------------------------------------------------------------------------
def _bridge_up_kernel(col5_ref, bmat_ref, cvec_ref, mask_ref, b2_ref,
                      g1_ref, be1_ref, w3_ref, b3_ref, g2_ref, be2_ref,
                      o_ref):
    # col5_ref : (25*Cin, NHW)   5x5 im2col of the (pad=2) input, lanes = N*H*W
    # bmat_ref : (9, Cin, 25*Cin) folded conv2∘conv1 weights, one per conv2 tap
    # cvec_ref : (9, Cin, 1)      folded conv2(b1) bias contribution per tap
    # mask_ref : (9, 1, NHW)      0/1 border masks (zero padding of y1)
    # b2/g1/be1: (Cin, 1)         conv2 bias, BN1 gamma/beta
    # w3_ref   : (4, Cout, Cin)   transpose-conv weight per output tap (p,q)
    # b3/g2/be2: (Cout, 1)        deconv bias, BN2 gamma/beta
    # o_ref    : (4, Cout, NHW)   lane-dense output slab
    col5 = col5_ref[...]
    cin = b2_ref.shape[0]
    nhw = col5.shape[1]

    # ---- conv1 -> conv2 (folded); zero padding of y1 handled by masks ----
    acc = jnp.zeros((cin, nhw), jnp.float32)
    for t in range(9):
        v = jnp.dot(bmat_ref[t], col5, preferred_element_type=jnp.float32)
        acc = acc + (v + cvec_ref[t]) * mask_ref[t]
    y2 = acc + b2_ref[...]

    # ---- BatchNorm (training-mode batch stats) + ReLU --------------------
    inv1 = 1.0 / jnp.float32(nhw)
    mu1 = jnp.sum(y2, axis=1, keepdims=True) * inv1
    d1 = y2 - mu1
    var1 = jnp.sum(d1 * d1, axis=1, keepdims=True) * inv1
    z = jnp.maximum(
        d1 * jax.lax.rsqrt(var1 + _EPS) * g1_ref[...] + be1_ref[...], 0.0)

    # ---- ConvTranspose2d(k=2, s=2): 4 non-overlapping taps ---------------
    y3 = [jnp.dot(w3_ref[t], z, preferred_element_type=jnp.float32) + b3_ref[...]
          for t in range(4)]

    # ---- BatchNorm over all 4 taps (= all output pixels) + ReLU ----------
    inv2 = 1.0 / jnp.float32(4 * nhw)
    mu2 = (jnp.sum(y3[0], axis=1, keepdims=True)
           + jnp.sum(y3[1], axis=1, keepdims=True)
           + jnp.sum(y3[2], axis=1, keepdims=True)
           + jnp.sum(y3[3], axis=1, keepdims=True)) * inv2
    d3 = [y - mu2 for y in y3]
    var2 = (jnp.sum(d3[0] * d3[0], axis=1, keepdims=True)
            + jnp.sum(d3[1] * d3[1], axis=1, keepdims=True)
            + jnp.sum(d3[2] * d3[2], axis=1, keepdims=True)
            + jnp.sum(d3[3] * d3[3], axis=1, keepdims=True)) * inv2
    s2 = jax.lax.rsqrt(var2 + _EPS) * g2_ref[...]
    for t in range(4):
        o_ref[t] = jnp.maximum(d3[t] * s2 + be2_ref[...], 0.0).astype(o_ref.dtype)


# --------------------------------------------------------------------------
# Wrapper-side glue (KB-sized, runs once under jit): weight folding, 5x5
# im2col of the input, border masks, and the final NCHW rearrangement.
# --------------------------------------------------------------------------
def _fold_params(p, N, H, W):
    w1, w2 = p["w1"], p["w2"]                      # (3, 3, Cin, Cin) HWIO
    cin = w1.shape[2]
    cout = p["w3"].shape[1]

    # Place W1 into the 5x5 tap frame at offset (a, b), fold with W2[a, b].
    w1_t = jnp.transpose(w1, (3, 0, 1, 2))          # (c1, dy, dx, ci)
    A = jnp.zeros((3, 3, cin, 5, 5, cin), jnp.float32)
    for a in range(3):
        for b in range(3):
            A = A.at[a, b, :, a:a + 3, b:b + 3, :].set(w1_t)
    A = A.reshape(3, 3, cin, 25 * cin)
    bmat = jnp.einsum("abij,abik->abjk", w2, A, precision=_HI)
    bmat = bmat.reshape(9, cin, 25 * cin)
    cvec = jnp.einsum("abij,i->abj", w2, p["b1"], precision=_HI)
    cvec = cvec.reshape(9, cin, 1)

    # 0/1 border masks reproducing the zero padding of the intermediate y1.
    def axis_mask(shift, n):
        i = jnp.arange(n) + (shift - 1)
        return ((i >= 0) & (i < n)).astype(jnp.float32)

    masks = []
    for a in range(3):
        for b in range(3):
            m = axis_mask(a, H)[:, None] * axis_mask(b, W)[None, :]
            masks.append(jnp.tile(m.reshape(1, H * W), (1, N)))
    mask = jnp.stack(masks, axis=0)                 # (9, 1, N*H*W)

    # ConvTranspose2d weight (Cin, Cout, 2, 2) -> per-tap (p*2+q, Cout, Cin)
    w3m = jnp.transpose(p["w3"], (2, 3, 1, 0)).reshape(4, cout, cin)
    return bmat, cvec, mask, w3m


def _build_col5(x_nchw):
    N, Cin, H, W = x_nchw.shape
    xp = jnp.pad(x_nchw, ((0, 0), (0, 0), (2, 2), (2, 2)))
    taps = [xp[:, :, u:u + H, v:v + W].reshape(N, Cin, H * W)
            for u in range(5) for v in range(5)]
    col5 = jnp.stack(taps, axis=1)                  # (N, 25, Cin, HW)
    col5 = col5.reshape(N, 25 * Cin, H * W)
    return jnp.transpose(col5, (1, 0, 2)).reshape(25 * Cin, N * H * W)


def bridge_up_forward(x_nchw, p):
    N, Cin, H, W = x_nchw.shape
    Cout = p["w3"].shape[1]
    NHW = N * H * W

    bmat, cvec, mask, w3m = _fold_params(p, N, H, W)
    col5 = _build_col5(x_nchw.astype(jnp.float32))

    vmem = pl.BlockSpec(memory_space=pltpu.MemorySpace.VMEM)
    o_flat = pl.pallas_call(
        _bridge_up_kernel,
        out_shape=jax.ShapeDtypeStruct((4, Cout, NHW), jnp.float32),
        in_specs=[vmem] * 11,
        out_specs=vmem,
    )(col5, bmat, cvec, mask,
      p["b2"].reshape(Cin, 1), p["g1"].reshape(Cin, 1), p["be1"].reshape(Cin, 1),
      w3m, p["b3"].reshape(Cout, 1), p["g2"].reshape(Cout, 1),
      p["be2"].reshape(Cout, 1))

    # (p, q, co, n, h, w) -> (n, co, 2h+p, 2w+q): output plumbing in XLA.
    o = o_flat.reshape(2, 2, Cout, N, H, W).transpose(3, 2, 4, 0, 5, 1)
    return o.reshape(N, Cout, 2 * H, 2 * W)


# --------------------------------------------------------------------------
# Pure-JAX reference (same math, f32-accurate) for a correctness check
# --------------------------------------------------------------------------
def _ref_conv3x3(x, w, b):
    y = jax.lax.conv_general_dilated(
        x, w, window_strides=(1, 1), padding=[(1, 1), (1, 1)],
        dimension_numbers=("NHWC", "HWIO", "NHWC"), precision=_HI)
    return y + b[None, None, None, :]


def _ref_deconv2x2s2(x, w, b):
    # x: (N, H, W, Cin); w: (Cin, Cout, 2, 2) (PyTorch ConvTranspose2d layout)
    N, H, W, _ = x.shape
    Cout = w.shape[1]
    y = jnp.einsum("nhwi,iopq->nhpwqo", x, w, precision=_HI)
    return y.reshape(N, 2 * H, 2 * W, Cout) + b[None, None, None, :]


def _ref_bn_relu(x, gamma, beta, eps=_EPS):
    mean = jnp.mean(x, axis=(0, 1, 2))
    var = jnp.mean(jnp.square(x - mean), axis=(0, 1, 2))
    return jnp.maximum((x - mean) * jax.lax.rsqrt(var + eps) * gamma + beta, 0.0)


def reference_forward(x_nchw, p):
    x = jnp.transpose(x_nchw, (0, 2, 3, 1))
    y1 = _ref_conv3x3(x, p["w1"], p["b1"])
    y2 = _ref_conv3x3(y1, p["w2"], p["b2"])
    z = _ref_bn_relu(y2, p["g1"], p["be1"])
    y3 = _ref_deconv2x2s2(z, p["w3"], p["b3"])
    o = _ref_bn_relu(y3, p["g2"], p["be2"])
    return jnp.transpose(o, (0, 3, 1, 2))


if __name__ == "__main__":
    N, Cin, H, W = 2, 4, 16, 16
    Cout = 8

    key = jax.random.PRNGKey(0)
    ks = jax.random.split(key, 11)
    x_nchw = jax.random.normal(ks[0], (N, Cin, H, W), jnp.float32)

    params = {
        "w1": jax.random.normal(ks[1], (3, 3, Cin, Cin), jnp.float32) * 0.2,
        "b1": jax.random.normal(ks[2], (Cin,), jnp.float32) * 0.1,
        "w2": jax.random.normal(ks[3], (3, 3, Cin, Cin), jnp.float32) * 0.2,
        "b2": jax.random.normal(ks[4], (Cin,), jnp.float32) * 0.1,
        "g1": 1.0 + 0.1 * jax.random.normal(ks[5], (Cin,), jnp.float32),
        "be1": 0.1 * jax.random.normal(ks[6], (Cin,), jnp.float32),
        "w3": jax.random.normal(ks[7], (Cin, Cout, 2, 2), jnp.float32) * 0.2,
        "b3": jax.random.normal(ks[8], (Cout,), jnp.float32) * 0.1,
        "g2": 1.0 + 0.1 * jax.random.normal(ks[9], (Cout,), jnp.float32),
        "be2": 0.1 * jax.random.normal(ks[10], (Cout,), jnp.float32),
    }

    out = jax.jit(bridge_up_forward)(x_nchw, params)
    out = jax.block_until_ready(out)

    ref = reference_forward(x_nchw, params)
    assert out.shape == (N, Cout, 2 * H, 2 * W), out.shape
    # The kernel uses the default (bf16-pass) MXU precision per the perf
    # review; structural errors would be O(1), so this bound is still a
    # strict correctness check while allowing documented MXU rounding.
    err = float(jnp.max(jnp.abs(out - ref)))
    assert err < 3e-2, err
    print("KERNEL_OK")
</pallas_src>

<mosaic_0001>
module attributes {stable_mosaic.version = 11 : i64} {
  func.func @_bridge_up_kernel(%arg0: memref<100x512xf32, #tpu.memory_space<vmem>>, %arg1: memref<9x4x100xf32, #tpu.memory_space<vmem>>, %arg2: memref<9x4x1xf32, #tpu.memory_space<vmem>>, %arg3: memref<9x1x512xf32, #tpu.memory_space<vmem>>, %arg4: memref<4x1xf32, #tpu.memory_space<vmem>>, %arg5: memref<4x1xf32, #tpu.memory_space<vmem>>, %arg6: memref<4x1xf32, #tpu.memory_space<vmem>>, %arg7: memref<4x8x4xf32, #tpu.memory_space<vmem>>, %arg8: memref<8x1xf32, #tpu.memory_space<vmem>>, %arg9: memref<8x1xf32, #tpu.memory_space<vmem>>, %arg10: memref<8x1xf32, #tpu.memory_space<vmem>>, %arg11: memref<4x8x512xf32, #tpu.memory_space<vmem>>) attributes {dimension_semantics = [], scalar_prefetch = 0 : i64, scratch_operands = 0 : i64, tpu.core_type = #tpu.core_type<tc>} {
    %c0 = arith.constant 0 : index
    %c0_0 = arith.constant 0 : index
    %0 = vector.load %arg0[%c0, %c0_0] : memref<100x512xf32, #tpu.memory_space<vmem>>, vector<100x512xf32>
    %cst = arith.constant 0.000000e+00 : f32
    %1 = vector.broadcast %cst : f32 to vector<4x512xf32>
    %c0_1 = arith.constant 0 : index
    %c0_2 = arith.constant 0 : index
    %c0_3 = arith.constant 0 : index
    %2 = vector.load %arg1[%c0_1, %c0_2, %c0_3] : memref<9x4x100xf32, #tpu.memory_space<vmem>>, vector<1x4x100xf32>
    %3 = vector.shape_cast %2 : vector<1x4x100xf32> to vector<4x100xf32>
    %cst_4 = arith.constant dense<0.000000e+00> : vector<4x512xf32>
    %4 = tpu.matmul %3, %0, %cst_4 {dimension_numbers = #tpu.dot_dimension_numbers<[1], [0], [0], [1], [0, 0, 1, 1], [], []>} : vector<4x100xf32>, vector<100x512xf32>, vector<4x512xf32> -> vector<4x512xf32>
    %c0_5 = arith.constant 0 : index
    %c0_6 = arith.constant 0 : index
    %c0_7 = arith.constant 0 : index
    %5 = vector.load %arg2[%c0_5, %c0_6, %c0_7] : memref<9x4x1xf32, #tpu.memory_space<vmem>>, vector<1x4x1xf32>
    %6 = vector.shape_cast %5 : vector<1x4x1xf32> to vector<4x1xf32>
    %7 = vector.broadcast %6 : vector<4x1xf32> to vector<4x512xf32>
    %8 = arith.addf %4, %7 : vector<4x512xf32>
    %c0_8 = arith.constant 0 : index
    %c0_9 = arith.constant 0 : index
    %c0_10 = arith.constant 0 : index
    %9 = vector.load %arg3[%c0_8, %c0_9, %c0_10] : memref<9x1x512xf32, #tpu.memory_space<vmem>>, vector<1x1x512xf32>
    %10 = vector.shape_cast %9 : vector<1x1x512xf32> to vector<1x512xf32>
    %11 = vector.broadcast %10 : vector<1x512xf32> to vector<4x512xf32>
    %12 = arith.mulf %8, %11 : vector<4x512xf32>
    %13 = arith.addf %1, %12 : vector<4x512xf32>
    %c1 = arith.constant 1 : index
    %c0_11 = arith.constant 0 : index
    %c0_12 = arith.constant 0 : index
    %14 = vector.load %arg1[%c1, %c0_11, %c0_12] : memref<9x4x100xf32, #tpu.memory_space<vmem>>, vector<1x4x100xf32>
    %15 = vector.shape_cast %14 : vector<1x4x100xf32> to vector<4x100xf32>
    %cst_13 = arith.constant dense<0.000000e+00> : vector<4x512xf32>
    %16 = tpu.matmul %15, %0, %cst_13 {dimension_numbers = #tpu.dot_dimension_numbers<[1], [0], [0], [1], [0, 0, 1, 1], [], []>} : vector<4x100xf32>, vector<100x512xf32>, vector<4x512xf32> -> vector<4x512xf32>
    %c1_14 = arith.constant 1 : index
    %c0_15 = arith.constant 0 : index
    %c0_16 = arith.constant 0 : index
    %17 = vector.load %arg2[%c1_14, %c0_15, %c0_16] : memref<9x4x1xf32, #tpu.memory_space<vmem>>, vector<1x4x1xf32>
    %18 = vector.shape_cast %17 : vector<1x4x1xf32> to vector<4x1xf32>
    %19 = vector.broadcast %18 : vector<4x1xf32> to vector<4x512xf32>
    %20 = arith.addf %16, %19 : vector<4x512xf32>
    %c1_17 = arith.constant 1 : index
    %c0_18 = arith.constant 0 : index
    %c0_19 = arith.constant 0 : index
    %21 = vector.load %arg3[%c1_17, %c0_18, %c0_19] : memref<9x1x512xf32, #tpu.memory_space<vmem>>, vector<1x1x512xf32>
    %22 = vector.shape_cast %21 : vector<1x1x512xf32> to vector<1x512xf32>
    %23 = vector.broadcast %22 : vector<1x512xf32> to vector<4x512xf32>
    %24 = arith.mulf %20, %23 : vector<4x512xf32>
    %25 = arith.addf %13, %24 : vector<4x512xf32>
    %c2 = arith.constant 2 : index
    %c0_20 = arith.constant 0 : index
    %c0_21 = arith.constant 0 : index
    %26 = vector.load %arg1[%c2, %c0_20, %c0_21] : memref<9x4x100xf32, #tpu.memory_space<vmem>>, vector<1x4x100xf32>
    %27 = vector.shape_cast %26 : vector<1x4x100xf32> to vector<4x100xf32>
    %cst_22 = arith.constant dense<0.000000e+00> : vector<4x512xf32>
    %28 = tpu.matmul %27, %0, %cst_22 {dimension_numbers = #tpu.dot_dimension_numbers<[1], [0], [0], [1], [0, 0, 1, 1], [], []>} : vector<4x100xf32>, vector<100x512xf32>, vector<4x512xf32> -> vector<4x512xf32>
    %c2_23 = arith.constant 2 : index
    %c0_24 = arith.constant 0 : index
    %c0_25 = arith.constant 0 : index
    %29 = vector.load %arg2[%c2_23, %c0_24, %c0_25] : memref<9x4x1xf32, #tpu.memory_space<vmem>>, vector<1x4x1xf32>
    %30 = vector.shape_cast %29 : vector<1x4x1xf32> to vector<4x1xf32>
    %31 = vector.broadcast %30 : vector<4x1xf32> to vector<4x512xf32>
    %32 = arith.addf %28, %31 : vector<4x512xf32>
    %c2_26 = arith.constant 2 : index
    %c0_27 = arith.constant 0 : index
    %c0_28 = arith.constant 0 : index
    %33 = vector.load %arg3[%c2_26, %c0_27, %c0_28] : memref<9x1x512xf32, #tpu.memory_space<vmem>>, vector<1x1x512xf32>
    %34 = vector.shape_cast %33 : vector<1x1x512xf32> to vector<1x512xf32>
    %35 = vector.broadcast %34 : vector<1x512xf32> to vector<4x512xf32>
    %36 = arith.mulf %32, %35 : vector<4x512xf32>
    %37 = arith.addf %25, %36 : vector<4x512xf32>
    %c3 = arith.constant 3 : index
    %c0_29 = arith.constant 0 : index
    %c0_30 = arith.constant 0 : index
    %38 = vector.load %arg1[%c3, %c0_29, %c0_30] : memref<9x4x100xf32, #tpu.memory_space<vmem>>, vector<1x4x100xf32>
    %39 = vector.shape_cast %38 : vector<1x4x100xf32> to vector<4x100xf32>
    %cst_31 = arith.constant dense<0.000000e+00> : vector<4x512xf32>
    %40 = tpu.matmul %39, %0, %cst_31 {dimension_numbers = #tpu.dot_dimension_numbers<[1], [0], [0], [1], [0, 0, 1, 1], [], []>} : vector<4x100xf32>, vector<100x512xf32>, vector<4x512xf32> -> vector<4x512xf32>
    %c3_32 = arith.constant 3 : index
    %c0_33 = arith.constant 0 : index
    %c0_34 = arith.constant 0 : index
    %41 = vector.load %arg2[%c3_32, %c0_33, %c0_34] : memref<9x4x1xf32, #tpu.memory_space<vmem>>, vector<1x4x1xf32>
    %42 = vector.shape_cast %41 : vector<1x4x1xf32> to vector<4x1xf32>
    %43 = vector.broadcast %42 : vector<4x1xf32> to vector<4x512xf32>
    %44 = arith.addf %40, %43 : vector<4x512xf32>
    %c3_35 = arith.constant 3 : index
    %c0_36 = arith.constant 0 : index
    %c0_37 = arith.constant 0 : index
    %45 = vector.load %arg3[%c3_35, %c0_36, %c0_37] : memref<9x1x512xf32, #tpu.memory_space<vmem>>, vector<1x1x512xf32>
    %46 = vector.shape_cast %45 : vector<1x1x512xf32> to vector<1x512xf32>
    %47 = vector.broadcast %46 : vector<1x512xf32> to vector<4x512xf32>
    %48 = arith.mulf %44, %47 : vector<4x512xf32>
    %49 = arith.addf %37, %48 : vector<4x512xf32>
    %c4 = arith.constant 4 : index
    %c0_38 = arith.constant 0 : index
    %c0_39 = arith.constant 0 : index
    %50 = vector.load %arg1[%c4, %c0_38, %c0_39] : memref<9x4x100xf32, #tpu.memory_space<vmem>>, vector<1x4x100xf32>
    %51 = vector.shape_cast %50 : vector<1x4x100xf32> to vector<4x100xf32>
    %cst_40 = arith.constant dense<0.000000e+00> : vector<4x512xf32>
    %52 = tpu.matmul %51, %0, %cst_40 {dimension_numbers = #tpu.dot_dimension_numbers<[1], [0], [0], [1], [0, 0, 1, 1], [], []>} : vector<4x100xf32>, vector<100x512xf32>, vector<4x512xf32> -> vector<4x512xf32>
    %c4_41 = arith.constant 4 : index
    %c0_42 = arith.constant 0 : index
    %c0_43 = arith.constant 0 : index
    %53 = vector.load %arg2[%c4_41, %c0_42, %c0_43] : memref<9x4x1xf32, #tpu.memory_space<vmem>>, vector<1x4x1xf32>
    %54 = vector.shape_cast %53 : vector<1x4x1xf32> to vector<4x1xf32>
    %55 = vector.broadcast %54 : vector<4x1xf32> to vector<4x512xf32>
    %56 = arith.addf %52, %55 : vector<4x512xf32>
    %c4_44 = arith.constant 4 : index
    %c0_45 = arith.constant 0 : index
    %c0_46 = arith.constant 0 : index
    %57 = vector.load %arg3[%c4_44, %c0_45, %c0_46] : memref<9x1x512xf32, #tpu.memory_space<vmem>>, vector<1x1x512xf32>
    %58 = vector.shape_cast %57 : vector<1x1x512xf32> to vector<1x512xf32>
    %59 = vector.broadcast %58 : vector<1x512xf32> to vector<4x512xf32>
    %60 = arith.mulf %56, %59 : vector<4x512xf32>
    %61 = arith.addf %49, %60 : vector<4x512xf32>
    %c5 = arith.constant 5 : index
    %c0_47 = arith.constant 0 : index
    %c0_48 = arith.constant 0 : index
    %62 = vector.load %arg1[%c5, %c0_47, %c0_48] : memref<9x4x100xf32, #tpu.memory_space<vmem>>, vector<1x4x100xf32>
    %63 = vector.shape_cast %62 : vector<1x4x100xf32> to vector<4x100xf32>
    %cst_49 = arith.constant dense<0.000000e+00> : vector<4x512xf32>
    %64 = tpu.matmul %63, %0, %cst_49 {dimension_numbers = #tpu.dot_dimension_numbers<[1], [0], [0], [1], [0, 0, 1, 1], [], []>} : vector<4x100xf32>, vector<100x512xf32>, vector<4x512xf32> -> vector<4x512xf32>
    %c5_50 = arith.constant 5 : index
    %c0_51 = arith.constant 0 : index
    %c0_52 = arith.constant 0 : index
    %65 = vector.load %arg2[%c5_50, %c0_51, %c0_52] : memref<9x4x1xf32, #tpu.memory_space<vmem>>, vector<1x4x1xf32>
    %66 = vector.shape_cast %65 : vector<1x4x1xf32> to vector<4x1xf32>
    %67 = vector.broadcast %66 : vector<4x1xf32> to vector<4x512xf32>
    %68 = arith.addf %64, %67 : vector<4x512xf32>
    %c5_53 = arith.constant 5 : index
    %c0_54 = arith.constant 0 : index
    %c0_55 = arith.constant 0 : index
    %69 = vector.load %arg3[%c5_53, %c0_54, %c0_55] : memref<9x1x512xf32, #tpu.memory_space<vmem>>, vector<1x1x512xf32>
    %70 = vector.shape_cast %69 : vector<1x1x512xf32> to vector<1x512xf32>
    %71 = vector.broadcast %70 : vector<1x512xf32> to vector<4x512xf32>
    %72 = arith.mulf %68, %71 : vector<4x512xf32>
    %73 = arith.addf %61, %72 : vector<4x512xf32>
    %c6 = arith.constant 6 : index
    %c0_56 = arith.constant 0 : index
    %c0_57 = arith.constant 0 : index
    %74 = vector.load %arg1[%c6, %c0_56, %c0_57] : memref<9x4x100xf32, #tpu.memory_space<vmem>>, vector<1x4x100xf32>
    %75 = vector.shape_cast %74 : vector<1x4x100xf32> to vector<4x100xf32>
    %cst_58 = arith.constant dense<0.000000e+00> : vector<4x512xf32>
    %76 = tpu.matmul %75, %0, %cst_58 {dimension_numbers = #tpu.dot_dimension_numbers<[1], [0], [0], [1], [0, 0, 1, 1], [], []>} : vector<4x100xf32>, vector<100x512xf32>, vector<4x512xf32> -> vector<4x512xf32>
    %c6_59 = arith.constant 6 : index
    %c0_60 = arith.constant 0 : index
    %c0_61 = arith.constant 0 : index
    %77 = vector.load %arg2[%c6_59, %c0_60, %c0_61] : memref<9x4x1xf32, #tpu.memory_space<vmem>>, vector<1x4x1xf32>
    %78 = vector.shape_cast %77 : vector<1x4x1xf32> to vector<4x1xf32>
    %79 = vector.broadcast %78 : vector<4x1xf32> to vector<4x512xf32>
    %80 = arith.addf %76, %79 : vector<4x512xf32>
    %c6_62 = arith.constant 6 : index
    %c0_63 = arith.constant 0 : index
    %c0_64 = arith.constant 0 : index
    %81 = vector.load %arg3[%c6_62, %c0_63, %c0_64] : memref<9x1x512xf32, #tpu.memory_space<vmem>>, vector<1x1x512xf32>
    %82 = vector.shape_cast %81 : vector<1x1x512xf32> to vector<1x512xf32>
    %83 = vector.broadcast %82 : vector<1x512xf32> to vector<4x512xf32>
    %84 = arith.mulf %80, %83 : vector<4x512xf32>
    %85 = arith.addf %73, %84 : vector<4x512xf32>
    %c7 = arith.constant 7 : index
    %c0_65 = arith.constant 0 : index
    %c0_66 = arith.constant 0 : index
    %86 = vector.load %arg1[%c7, %c0_65, %c0_66] : memref<9x4x100xf32, #tpu.memory_space<vmem>>, vector<1x4x100xf32>
    %87 = vector.shape_cast %86 : vector<1x4x100xf32> to vector<4x100xf32>
    %cst_67 = arith.constant dense<0.000000e+00> : vector<4x512xf32>
    %88 = tpu.matmul %87, %0, %cst_67 {dimension_numbers = #tpu.dot_dimension_numbers<[1], [0], [0], [1], [0, 0, 1, 1], [], []>} : vector<4x100xf32>, vector<100x512xf32>, vector<4x512xf32> -> vector<4x512xf32>
    %c7_68 = arith.constant 7 : index
    %c0_69 = arith.constant 0 : index
    %c0_70 = arith.constant 0 : index
    %89 = vector.load %arg2[%c7_68, %c0_69, %c0_70] : memref<9x4x1xf32, #tpu.memory_space<vmem>>, vector<1x4x1xf32>
    %90 = vector.shape_cast %89 : vector<1x4x1xf32> to vector<4x1xf32>
    %91 = vector.broadcast %90 : vector<4x1xf32> to vector<4x512xf32>
    %92 = arith.addf %88, %91 : vector<4x512xf32>
    %c7_71 = arith.constant 7 : index
    %c0_72 = arith.constant 0 : index
    %c0_73 = arith.constant 0 : index
    %93 = vector.load %arg3[%c7_71, %c0_72, %c0_73] : memref<9x1x512xf32, #tpu.memory_space<vmem>>, vector<1x1x512xf32>
    %94 = vector.shape_cast %93 : vector<1x1x512xf32> to vector<1x512xf32>
    %95 = vector.broadcast %94 : vector<1x512xf32> to vector<4x512xf32>
    %96 = arith.mulf %92, %95 : vector<4x512xf32>
    %97 = arith.addf %85, %96 : vector<4x512xf32>
    %c8 = arith.constant 8 : index
    %c0_74 = arith.constant 0 : index
    %c0_75 = arith.constant 0 : index
    %98 = vector.load %arg1[%c8, %c0_74, %c0_75] : memref<9x4x100xf32, #tpu.memory_space<vmem>>, vector<1x4x100xf32>
    %99 = vector.shape_cast %98 : vector<1x4x100xf32> to vector<4x100xf32>
    %cst_76 = arith.constant dense<0.000000e+00> : vector<4x512xf32>
    %100 = tpu.matmul %99, %0, %cst_76 {dimension_numbers = #tpu.dot_dimension_numbers<[1], [0], [0], [1], [0, 0, 1, 1], [], []>} : vector<4x100xf32>, vector<100x512xf32>, vector<4x512xf32> -> vector<4x512xf32>
    %c8_77 = arith.constant 8 : index
    %c0_78 = arith.constant 0 : index
    %c0_79 = arith.constant 0 : index
    %101 = vector.load %arg2[%c8_77, %c0_78, %c0_79] : memref<9x4x1xf32, #tpu.memory_space<vmem>>, vector<1x4x1xf32>
    %102 = vector.shape_cast %101 : vector<1x4x1xf32> to vector<4x1xf32>
    %103 = vector.broadcast %102 : vector<4x1xf32> to vector<4x512xf32>
    %104 = arith.addf %100, %103 : vector<4x512xf32>
    %c8_80 = arith.constant 8 : index
    %c0_81 = arith.constant 0 : index
    %c0_82 = arith.constant 0 : index
    %105 = vector.load %arg3[%c8_80, %c0_81, %c0_82] : memref<9x1x512xf32, #tpu.memory_space<vmem>>, vector<1x1x512xf32>
    %106 = vector.shape_cast %105 : vector<1x1x512xf32> to vector<1x512xf32>
    %107 = vector.broadcast %106 : vector<1x512xf32> to vector<4x512xf32>
    %108 = arith.mulf %104, %107 : vector<4x512xf32>
    %109 = arith.addf %97, %108 : vector<4x512xf32>
    %c0_83 = arith.constant 0 : index
    %c0_84 = arith.constant 0 : index
    %110 = vector.load %arg4[%c0_83, %c0_84] : memref<4x1xf32, #tpu.memory_space<vmem>>, vector<4x1xf32>
    %111 = vector.broadcast %110 : vector<4x1xf32> to vector<4x512xf32>
    %112 = arith.addf %109, %111 : vector<4x512xf32>
    %cst_85 = arith.constant 1.000000e+00 : f32
    %cst_86 = arith.constant 5.120000e+02 : f32
    %113 = arith.divf %cst_85, %cst_86 : f32
    %cst_87 = arith.constant dense<0.000000e+00> : vector<4xf32>
    %114 = vector.multi_reduction <add>, %112, %cst_87 [1] : vector<4x512xf32> to vector<4xf32>
    %115 = vector.shape_cast %114 : vector<4xf32> to vector<4x1xf32>
    %116 = vector.broadcast %113 : f32 to vector<4x1xf32>
    %117 = arith.mulf %115, %116 : vector<4x1xf32>
    %118 = vector.broadcast %117 : vector<4x1xf32> to vector<4x512xf32>
    %119 = arith.subf %112, %118 : vector<4x512xf32>
    %120 = arith.mulf %119, %119 : vector<4x512xf32>
    %cst_88 = arith.constant dense<0.000000e+00> : vector<4xf32>
    %121 = vector.multi_reduction <add>, %120, %cst_88 [1] : vector<4x512xf32> to vector<4xf32>
    %122 = vector.shape_cast %121 : vector<4xf32> to vector<4x1xf32>
    %123 = vector.broadcast %113 : f32 to vector<4x1xf32>
    %124 = arith.mulf %122, %123 : vector<4x1xf32>
    %cst_89 = arith.constant 9.99999974E-6 : f32
    %125 = vector.broadcast %cst_89 : f32 to vector<4x1xf32>
    %126 = arith.addf %124, %125 : vector<4x1xf32>
    %127 = math.rsqrt %126 : vector<4x1xf32>
    %128 = vector.broadcast %127 : vector<4x1xf32> to vector<4x512xf32>
    %129 = arith.mulf %119, %128 : vector<4x512xf32>
    %c0_90 = arith.constant 0 : index
    %c0_91 = arith.constant 0 : index
    %130 = vector.load %arg5[%c0_90, %c0_91] : memref<4x1xf32, #tpu.memory_space<vmem>>, vector<4x1xf32>
    %131 = vector.broadcast %130 : vector<4x1xf32> to vector<4x512xf32>
    %132 = arith.mulf %129, %131 : vector<4x512xf32>
    %c0_92 = arith.constant 0 : index
    %c0_93 = arith.constant 0 : index
    %133 = vector.load %arg6[%c0_92, %c0_93] : memref<4x1xf32, #tpu.memory_space<vmem>>, vector<4x1xf32>
    %134 = vector.broadcast %133 : vector<4x1xf32> to vector<4x512xf32>
    %135 = arith.addf %132, %134 : vector<4x512xf32>
    %cst_94 = arith.constant 0.000000e+00 : f32
    %136 = vector.broadcast %cst_94 : f32 to vector<4x512xf32>
    %137 = arith.maximumf %135, %136 : vector<4x512xf32>
    %c0_95 = arith.constant 0 : index
    %c0_96 = arith.constant 0 : index
    %c0_97 = arith.constant 0 : index
    %138 = vector.load %arg7[%c0_95, %c0_96, %c0_97] : memref<4x8x4xf32, #tpu.memory_space<vmem>>, vector<1x8x4xf32>
    %139 = vector.shape_cast %138 : vector<1x8x4xf32> to vector<8x4xf32>
    %cst_98 = arith.constant dense<0.000000e+00> : vector<8x512xf32>
    %140 = tpu.matmul %139, %137, %cst_98 {dimension_numbers = #tpu.dot_dimension_numbers<[1], [0], [0], [1], [0, 0, 1, 1], [], []>} : vector<8x4xf32>, vector<4x512xf32>, vector<8x512xf32> -> vector<8x512xf32>
    %c0_99 = arith.constant 0 : index
    %c0_100 = arith.constant 0 : index
    %141 = vector.load %arg8[%c0_99, %c0_100] : memref<8x1xf32, #tpu.memory_space<vmem>>, vector<8x1xf32>
    %142 = vector.broadcast %141 : vector<8x1xf32> to vector<8x512xf32>
    %143 = arith.addf %140, %142 : vector<8x512xf32>
    %c1_101 = arith.constant 1 : index
    %c0_102 = arith.constant 0 : index
    %c0_103 = arith.constant 0 : index
    %144 = vector.load %arg7[%c1_101, %c0_102, %c0_103] : memref<4x8x4xf32, #tpu.memory_space<vmem>>, vector<1x8x4xf32>
    %145 = vector.shape_cast %144 : vector<1x8x4xf32> to vector<8x4xf32>
    %cst_104 = arith.constant dense<0.000000e+00> : vector<8x512xf32>
    %146 = tpu.matmul %145, %137, %cst_104 {dimension_numbers = #tpu.dot_dimension_numbers<[1], [0], [0], [1], [0, 0, 1, 1], [], []>} : vector<8x4xf32>, vector<4x512xf32>, vector<8x512xf32> -> vector<8x512xf32>
    %c0_105 = arith.constant 0 : index
    %c0_106 = arith.constant 0 : index
    %147 = vector.load %arg8[%c0_105, %c0_106] : memref<8x1xf32, #tpu.memory_space<vmem>>, vector<8x1xf32>
    %148 = vector.broadcast %147 : vector<8x1xf32> to vector<8x512xf32>
    %149 = arith.addf %146, %148 : vector<8x512xf32>
    %c2_107 = arith.constant 2 : index
    %c0_108 = arith.constant 0 : index
    %c0_109 = arith.constant 0 : index
    %150 = vector.load %arg7[%c2_107, %c0_108, %c0_109] : memref<4x8x4xf32, #tpu.memory_space<vmem>>, vector<1x8x4xf32>
    %151 = vector.shape_cast %150 : vector<1x8x4xf32> to vector<8x4xf32>
    %cst_110 = arith.constant dense<0.000000e+00> : vector<8x512xf32>
    %152 = tpu.matmul %151, %137, %cst_110 {dimension_numbers = #tpu.dot_dimension_numbers<[1], [0], [0], [1], [0, 0, 1, 1], [], []>} : vector<8x4xf32>, vector<4x512xf32>, vector<8x512xf32> -> vector<8x512xf32>
    %c0_111 = arith.constant 0 : index
    %c0_112 = arith.constant 0 : index
    %153 = vector.load %arg8[%c0_111, %c0_112] : memref<8x1xf32, #tpu.memory_space<vmem>>, vector<8x1xf32>
    %154 = vector.broadcast %153 : vector<8x1xf32> to vector<8x512xf32>
    %155 = arith.addf %152, %154 : vector<8x512xf32>
    %c3_113 = arith.constant 3 : index
    %c0_114 = arith.constant 0 : index
    %c0_115 = arith.constant 0 : index
    %156 = vector.load %arg7[%c3_113, %c0_114, %c0_115] : memref<4x8x4xf32, #tpu.memory_space<vmem>>, vector<1x8x4xf32>
    %157 = vector.shape_cast %156 : vector<1x8x4xf32> to vector<8x4xf32>
    %cst_116 = arith.constant dense<0.000000e+00> : vector<8x512xf32>
    %158 = tpu.matmul %157, %137, %cst_116 {dimension_numbers = #tpu.dot_dimension_numbers<[1], [0], [0], [1], [0, 0, 1, 1], [], []>} : vector<8x4xf32>, vector<4x512xf32>, vector<8x512xf32> -> vector<8x512xf32>
    %c0_117 = arith.constant 0 : index
    %c0_118 = arith.constant 0 : index
    %159 = vector.load %arg8[%c0_117, %c0_118] : memref<8x1xf32, #tpu.memory_space<vmem>>, vector<8x1xf32>
    %160 = vector.broadcast %159 : vector<8x1xf32> to vector<8x512xf32>
    %161 = arith.addf %158, %160 : vector<8x512xf32>
    %cst_119 = arith.constant 1.000000e+00 : f32
    %cst_120 = arith.constant 2.048000e+03 : f32
    %162 = arith.divf %cst_119, %cst_120 : f32
    %cst_121 = arith.constant dense<0.000000e+00> : vector<8xf32>
    %163 = vector.multi_reduction <add>, %143, %cst_121 [1] : vector<8x512xf32> to vector<8xf32>
    %164 = vector.shape_cast %163 : vector<8xf32> to vector<8x1xf32>
    %cst_122 = arith.constant dense<0.000000e+00> : vector<8xf32>
    %165 = vector.multi_reduction <add>, %149, %cst_122 [1] : vector<8x512xf32> to vector<8xf32>
    %166 = vector.shape_cast %165 : vector<8xf32> to vector<8x1xf32>
    %167 = arith.addf %164, %166 : vector<8x1xf32>
    %cst_123 = arith.constant dense<0.000000e+00> : vector<8xf32>
    %168 = vector.multi_reduction <add>, %155, %cst_123 [1] : vector<8x512xf32> to vector<8xf32>
    %169 = vector.shape_cast %168 : vector<8xf32> to vector<8x1xf32>
    %170 = arith.addf %167, %169 : vector<8x1xf32>
    %cst_124 = arith.constant dense<0.000000e+00> : vector<8xf32>
    %171 = vector.multi_reduction <add>, %161, %cst_124 [1] : vector<8x512xf32> to vector<8xf32>
    %172 = vector.shape_cast %171 : vector<8xf32> to vector<8x1xf32>
    %173 = arith.addf %170, %172 : vector<8x1xf32>
    %174 = vector.broadcast %162 : f32 to vector<8x1xf32>
    %175 = arith.mulf %173, %174 : vector<8x1xf32>
    %176 = vector.broadcast %175 : vector<8x1xf32> to vector<8x512xf32>
    %177 = arith.subf %143, %176 : vector<8x512xf32>
    %178 = vector.broadcast %175 : vector<8x1xf32> to vector<8x512xf32>
    %179 = arith.subf %149, %178 : vector<8x512xf32>
    %180 = vector.broadcast %175 : vector<8x1xf32> to vector<8x512xf32>
    %181 = arith.subf %155, %180 : vector<8x512xf32>
    %182 = vector.broadcast %175 : vector<8x1xf32> to vector<8x512xf32>
    %183 = arith.subf %161, %182 : vector<8x512xf32>
    %184 = arith.mulf %177, %177 : vector<8x512xf32>
    %cst_125 = arith.constant dense<0.000000e+00> : vector<8xf32>
    %185 = vector.multi_reduction <add>, %184, %cst_125 [1] : vector<8x512xf32> to vector<8xf32>
    %186 = vector.shape_cast %185 : vector<8xf32> to vector<8x1xf32>
    %187 = arith.mulf %179, %179 : vector<8x512xf32>
    %cst_126 = arith.constant dense<0.000000e+00> : vector<8xf32>
    %188 = vector.multi_reduction <add>, %187, %cst_126 [1] : vector<8x512xf32> to vector<8xf32>
    %189 = vector.shape_cast %188 : vector<8xf32> to vector<8x1xf32>
    %190 = arith.addf %186, %189 : vector<8x1xf32>
    %191 = arith.mulf %181, %181 : vector<8x512xf32>
    %cst_127 = arith.constant dense<0.000000e+00> : vector<8xf32>
    %192 = vector.multi_reduction <add>, %191, %cst_127 [1] : vector<8x512xf32> to vector<8xf32>
    %193 = vector.shape_cast %192 : vector<8xf32> to vector<8x1xf32>
    %194 = arith.addf %190, %193 : vector<8x1xf32>
    %195 = arith.mulf %183, %183 : vector<8x512xf32>
    %cst_128 = arith.constant dense<0.000000e+00> : vector<8xf32>
    %196 = vector.multi_reduction <add>, %195, %cst_128 [1] : vector<8x512xf32> to vector<8xf32>
    %197 = vector.shape_cast %196 : vector<8xf32> to vector<8x1xf32>
    %198 = arith.addf %194, %197 : vector<8x1xf32>
    %199 = vector.broadcast %162 : f32 to vector<8x1xf32>
    %200 = arith.mulf %198, %199 : vector<8x1xf32>
    %cst_129 = arith.constant 9.99999974E-6 : f32
    %201 = vector.broadcast %cst_129 : f32 to vector<8x1xf32>
    %202 = arith.addf %200, %201 : vector<8x1xf32>
    %203 = math.rsqrt %202 : vector<8x1xf32>
    %c0_130 = arith.constant 0 : index
    %c0_131 = arith.constant 0 : index
    %204 = vector.load %arg9[%c0_130, %c0_131] : memref<8x1xf32, #tpu.memory_space<vmem>>, vector<8x1xf32>
    %205 = arith.mulf %203, %204 : vector<8x1xf32>
    %206 = vector.broadcast %205 : vector<8x1xf32> to vector<8x512xf32>
    %207 = arith.mulf %177, %206 : vector<8x512xf32>
    %c0_132 = arith.constant 0 : index
    %c0_133 = arith.constant 0 : index
    %208 = vector.load %arg10[%c0_132, %c0_133] : memref<8x1xf32, #tpu.memory_space<vmem>>, vector<8x1xf32>
    %209 = vector.broadcast %208 : vector<8x1xf32> to vector<8x512xf32>
    %210 = arith.addf %207, %209 : vector<8x512xf32>
    %cst_134 = arith.constant 0.000000e+00 : f32
    %211 = vector.broadcast %cst_134 : f32 to vector<8x512xf32>
    %212 = arith.maximumf %210, %211 : vector<8x512xf32>
    %c0_135 = arith.constant 0 : index
    %c0_136 = arith.constant 0 : index
    %c0_137 = arith.constant 0 : index
    %213 = vector.load %arg11[%c0_135, %c0_136, %c0_137] : memref<4x8x512xf32, #tpu.memory_space<vmem>>, vector<1x8x512xf32>
    %214 = vector.shape_cast %213 : vector<1x8x512xf32> to vector<8x512xf32>
    %215 = vector.shape_cast %212 : vector<8x512xf32> to vector<1x8x512xf32>
    tpu.vector_store %arg11[%c0_135, %c0_136, %c0_137], %215 {strides = array<i32>} : memref<4x8x512xf32, #tpu.memory_space<vmem>>, vector<1x8x512xf32>,
    %216 = vector.broadcast %205 : vector<8x1xf32> to vector<8x512xf32>
    %217 = arith.mulf %179, %216 : vector<8x512xf32>
    %c0_138 = arith.constant 0 : index
    %c0_139 = arith.constant 0 : index
    %218 = vector.load %arg10[%c0_138, %c0_139] : memref<8x1xf32, #tpu.memory_space<vmem>>, vector<8x1xf32>
    %219 = vector.broadcast %218 : vector<8x1xf32> to vector<8x512xf32>
    %220 = arith.addf %217, %219 : vector<8x512xf32>
    %cst_140 = arith.constant 0.000000e+00 : f32
    %221 = vector.broadcast %cst_140 : f32 to vector<8x512xf32>
    %222 = arith.maximumf %220, %221 : vector<8x512xf32>
    %c1_141 = arith.constant 1 : index
    %c0_142 = arith.constant 0 : index
    %c0_143 = arith.constant 0 : index
    %223 = vector.load %arg11[%c1_141, %c0_142, %c0_143] : memref<4x8x512xf32, #tpu.memory_space<vmem>>, vector<1x8x512xf32>
    %224 = vector.shape_cast %223 : vector<1x8x512xf32> to vector<8x512xf32>
    %225 = vector.shape_cast %222 : vector<8x512xf32> to vector<1x8x512xf32>
    tpu.vector_store %arg11[%c1_141, %c0_142, %c0_143], %225 {strides = array<i32>} : memref<4x8x512xf32, #tpu.memory_space<vmem>>, vector<1x8x512xf32>,
    %226 = vector.broadcast %205 : vector<8x1xf32> to vector<8x512xf32>
    %227 = arith.mulf %181, %226 : vector<8x512xf32>
    %c0_144 = arith.constant 0 : index
    %c0_145 = arith.constant 0 : index
    %228 = vector.load %arg10[%c0_144, %c0_145] : memref<8x1xf32, #tpu.memory_space<vmem>>, vector<8x1xf32>
    %229 = vector.broadcast %228 : vector<8x1xf32> to vector<8x512xf32>
    %230 = arith.addf %227, %229 : vector<8x512xf32>
    %cst_146 = arith.constant 0.000000e+00 : f32
    %231 = vector.broadcast %cst_146 : f32 to vector<8x512xf32>
    %232 = arith.maximumf %230, %231 : vector<8x512xf32>
    %c2_147 = arith.constant 2 : index
    %c0_148 = arith.constant 0 : index
    %c0_149 = arith.constant 0 : index
    %233 = vector.load %arg11[%c2_147, %c0_148, %c0_149] : memref<4x8x512xf32, #tpu.memory_space<vmem>>, vector<1x8x512xf32>
    %234 = vector.shape_cast %233 : vector<1x8x512xf32> to vector<8x512xf32>
    %235 = vector.shape_cast %232 : vector<8x512xf32> to vector<1x8x512xf32>
    tpu.vector_store %arg11[%c2_147, %c0_148, %c0_149], %235 {strides = array<i32>} : memref<4x8x512xf32, #tpu.memory_space<vmem>>, vector<1x8x512xf32>,
    %236 = vector.broadcast %205 : vector<8x1xf32> to vector<8x512xf32>
    %237 = arith.mulf %183, %236 : vector<8x512xf32>
    %c0_150 = arith.constant 0 : index
    %c0_151 = arith.constant 0 : index
    %238 = vector.load %arg10[%c0_150, %c0_151] : memref<8x1xf32, #tpu.memory_space<vmem>>, vector<8x1xf32>
    %239 = vector.broadcast %238 : vector<8x1xf32> to vector<8x512xf32>
    %240 = arith.addf %237, %239 : vector<8x512xf32>
    %cst_152 = arith.constant 0.000000e+00 : f32
    %241 = vector.broadcast %cst_152 : f32 to vector<8x512xf32>
    %242 = arith.maximumf %240, %241 : vector<8x512xf32>
    %c3_153 = arith.constant 3 : index
    %c0_154 = arith.constant 0 : index
    %c0_155 = arith.constant 0 : index
    %243 = vector.load %arg11[%c3_153, %c0_154, %c0_155] : memref<4x8x512xf32, #tpu.memory_space<vmem>>, vector<1x8x512xf32>
    %244 = vector.shape_cast %243 : vector<1x8x512xf32> to vector<8x512xf32>
    %245 = vector.shape_cast %242 : vector<8x512xf32> to vector<1x8x512xf32>
    tpu.vector_store %arg11[%c3_153, %c0_154, %c0_155], %245 {strides = array<i32>} : memref<4x8x512xf32, #tpu.memory_space<vmem>>, vector<1x8x512xf32>,
    return
  }
}

</mosaic_0001>

<bundles_post_ra>
// kernel: bridge_up_forward.1
= control target key start
LH: loop header
LB: loop body
LE: loop exit
PB: predicated region body
PF: predicated region fallthrough
CT: control target
= control target key end

     0   :  { %vm101_vm0 = vcmask 1043456   ;;  %v2765_v3 = vmov 0.0   ;;  %vm97_vm1 = vcmask 818176   ;;  %v2766_v57 = vmov 0   ;;  %s4074_s0 = inlined_call_operand.vmem [shape: f32[100,512], index: 0, kind: input, shape index: {}]   ;;  %s4075_s1 = inlined_call_operand.vmem [shape: f32[9,4,100], index: 1, kind: input, shape index: {}]   ;;  %s4076_s2 = inlined_call_operand.vmem [shape: f32[9,4,1], index: 2, kind: input, shape index: {}]   ;;  %s4077_s4 = inlined_call_operand.vmem [shape: f32[4,1], index: 4, kind: input, shape index: {}]   ;;  %s4078_s3 = inlined_call_operand.vmem [shape: f32[9,1,512], index: 3, kind: input, shape index: {}]   ;;  %s4079_s5 = inlined_call_operand.vmem [shape: f32[4,1], index: 5, kind: input, shape index: {}]   ;;  %s4080_s8 = inlined_call_operand.vmem [shape: f32[8,1], index: 8, kind: input, shape index: {}]   ;;  %s4081_s6 = inlined_call_operand.vmem [shape: f32[4,1], index: 6, kind: input, shape index: {}]   ;;  %s4082_s7 = inlined_call_operand.vmem [shape: f32[4,8,4], index: 7, kind: input, shape index: {}]   ;;  %s4083_s10 = inlined_call_operand.vmem [shape: f32[8,1], index: 10, kind: input, shape index: {}]   ;;  %s4084_s9 = inlined_call_operand.vmem [shape: f32[8,1], index: 9, kind: input, shape index: {}]   ;;  %s4085_s11 = inlined_call_operand.vmem [shape: f32[4,8,512], index: 11, kind: output, shape index: {}]  }
   0x1   :  { %v2830_v0 = vld [vmem:[%s4074_s0 + $0x188] sm:$0xf]  ;;  %v2835_v1 = vld [vmem:[%s4074_s0 + $0x198] sm:$0xf]  ;;  %v2840_v2 = vld [vmem:[%s4074_s0 + $0x180] sm:$0xf]  ;;  %178 = vmatprep.mubr.f32.mxu0 %v2765_v3  ;;  %249 = vmatprep.mubr.f32.mxu1 %v2765_v3 }
   0x2   :  { %2624 = vmatprep.subr.msk.mxu0 %vm101_vm0, %v2830_v0  ;;  %2627 = vmatprep.subr.msk.mxu1 %vm101_vm0, %v2835_v1  ;;  %v2851_v4 = vld [vmem:[%s4074_s0 + $0x190] sm:$0xf]  ;;  %v2856_v5 = vld [vmem:[%s4074_s0 + $0x168] sm:$0xff]  ;;  %v2861_v6 = vld [vmem:[%s4074_s0 + $0x178] sm:$0xff]  ;;  %vm1841_vm2 = vcmask 31744  }
   0x3   :  { %2625 = vmatpush1.msk.msra.mxu0 %vm101_vm0, %v2840_v2  ;;  %2628 = vmatpush1.msk.msra.mxu1 %vm101_vm0, %v2851_v4  ;;  %v2870_v7 = vld [vmem:[%s4074_s0 + $0x160] sm:$0xff]  ;;  %v2875_v8 = vld [vmem:[%s4074_s0 + $0x170] sm:$0xff]  ;;  %v2880_v9 = vld [vmem:[%s4074_s0 + $0x148] sm:$0xff] }
   0x4   :  { %122 = vmatprep.subr.mxu0 %v2856_v5  ;;  %193 = vmatprep.subr.mxu1 %v2861_v6  ;;  %v2887_v10 = vld [vmem:[%s4074_s0 + $0x158] sm:$0xff]  ;;  %v2892_v11 = vld [vmem:[%s4074_s0 + $0x140] sm:$0xff]  ;;  %v2897_v12 = vld [vmem:[%s4074_s0 + $0x150] sm:$0xff] }
   0x5   :  { %123 = vmatpush1.msra.mxu0 %v2870_v7  ;;  %194 = vmatpush1.msra.mxu1 %v2875_v8  ;;  %v2904_v13 = vld [vmem:[%s4074_s0 + $0x128] sm:$0xff]  ;;  %v2909_v14 = vld [vmem:[%s4074_s0 + $0x138] sm:$0xff]  ;;  %v2916_v15 = vld [vmem:[%s4074_s0 + $0x120] sm:$0xff] }
   0x6   :  { %124 = vmatprep.subr.mxu0 %v2880_v9  ;;  %195 = vmatprep.subr.mxu1 %v2887_v10  ;;  %v2921_v16 = vld [vmem:[%s4074_s0 + $0x130] sm:$0xff]  ;;  %v2928_v17 = vld [vmem:[%s4074_s0 + $0x108] sm:$0xff]  ;;  %v2933_v18 = vld [vmem:[%s4074_s0 + $0x118] sm:$0xff] }
   0x7   :  { %125 = vmatpush1.msra.mxu0 %v2892_v11  ;;  %196 = vmatpush1.msra.mxu1 %v2897_v12  ;;  %v2940_v19 = vld [vmem:[%s4074_s0 + $0x100] sm:$0xff]  ;;  %v2945_v20 = vld [vmem:[%s4074_s0 + $0x110] sm:$0xff]  ;;  %v2952_v21 = vld [vmem:[%s4074_s0 + $0xe8] sm:$0xff] }
   0x8   :  { %126 = vmatprep.subr.mxu0 %v2904_v13  ;;  %197 = vmatprep.subr.mxu1 %v2909_v14  ;;  %v2957_v22 = vld [vmem:[%s4074_s0 + $0xf8] sm:$0xff]  ;;  %v2964_v23 = vld [vmem:[%s4074_s0 + $0xe0] sm:$0xff]  ;;  %v2969_v24 = vld [vmem:[%s4074_s0 + $0xf0] sm:$0xff] }
   0x9   :  { %127 = vmatpush1.msra.mxu0 %v2916_v15  ;;  %198 = vmatpush1.msra.mxu1 %v2921_v16  ;;  %v2976_v25 = vld [vmem:[%s4074_s0 + $0xc8] sm:$0xff]  ;;  %v2981_v26 = vld [vmem:[%s4074_s0 + $0xd8] sm:$0xff]  ;;  %v2988_v27 = vld [vmem:[%s4074_s0 + $0xc0] sm:$0xff] }
   0xa   :  { %128 = vmatprep.subr.mxu0 %v2928_v17  ;;  %199 = vmatprep.subr.mxu1 %v2933_v18  ;;  %v2993_v28 = vld [vmem:[%s4074_s0 + $0xd0] sm:$0xff]  ;;  %v3000_v29 = vld [vmem:[%s4074_s0 + $0xa8] sm:$0xff]  ;;  %v3005_v30 = vld [vmem:[%s4074_s0 + $0xb8] sm:$0xff] }
   0xb   :  { %129 = vmatpush1.msra.mxu0 %v2940_v19  ;;  %200 = vmatpush1.msra.mxu1 %v2945_v20  ;;  %v3012_v31 = vld [vmem:[%s4074_s0 + $0xa0] sm:$0xff]  ;;  %v3017_v32 = vld [vmem:[%s4074_s0 + $0xb0] sm:$0xff]  ;;  %v3024_v33 = vld [vmem:[%s4074_s0 + $0x88] sm:$0xff] }
   0xc   :  { %130 = vmatprep.subr.mxu0 %v2952_v21  ;;  %201 = vmatprep.subr.mxu1 %v2957_v22  ;;  %v3029_v34 = vld [vmem:[%s4074_s0 + $0x98] sm:$0xff]  ;;  %v3036_v35 = vld [vmem:[%s4074_s0 + $0x80] sm:$0xff]  ;;  %v3041_v36 = vld [vmem:[%s4074_s0 + $0x90] sm:$0xff] }
   0xd   :  { %131 = vmatpush1.msra.mxu0 %v2964_v23  ;;  %202 = vmatpush1.msra.mxu1 %v2969_v24  ;;  %v3048_v37 = vld [vmem:[%s4074_s0 + $0x68] sm:$0xff]  ;;  %v3053_v38 = vld [vmem:[%s4074_s0 + $0x78] sm:$0xff]  ;;  %v3060_v39 = vld [vmem:[%s4074_s0 + $0x60] sm:$0xff] }
   0xe   :  { %132 = vmatprep.subr.mxu0 %v2976_v25  ;;  %203 = vmatprep.subr.mxu1 %v2981_v26  ;;  %v3065_v40 = vld [vmem:[%s4074_s0 + $0x70] sm:$0xff]  ;;  %v3072_v41 = vld [vmem:[%s4074_s0 + $0x48] sm:$0xff]  ;;  %v3077_v42 = vld [vmem:[%s4074_s0 + $0x58] sm:$0xff] }
   0xf   :  { %133 = vmatpush1.msra.mxu0 %v2988_v27  ;;  %204 = vmatpush1.msra.mxu1 %v2993_v28  ;;  %v3084_v43 = vld [vmem:[%s4074_s0 + $0x40] sm:$0xff]  ;;  %v3089_v44 = vld [vmem:[%s4074_s0 + $0x50] sm:$0xff]  ;;  %v3096_v45 = vld [vmem:[%s4074_s0 + $0x28] sm:$0xff] }
  0x10   :  { %134 = vmatprep.subr.mxu0 %v3000_v29  ;;  %205 = vmatprep.subr.mxu1 %v3005_v30  ;;  %v3101_v46 = vld [vmem:[%s4074_s0 + $0x38] sm:$0xff]  ;;  %v3108_v47 = vld [vmem:[%s4074_s0 + $0x20] sm:$0xff]  ;;  %v3113_v48 = vld [vmem:[%s4074_s0 + $0x30] sm:$0xff] }
  0x11   :  { %135 = vmatpush1.msra.mxu0 %v3012_v31  ;;  %206 = vmatpush1.msra.mxu1 %v3017_v32  ;;  %v3120_v49 = vld [vmem:[%s4074_s0 + $0x8] sm:$0xff]  ;;  %v3125_v50 = vld [vmem:[%s4074_s0 + $0x18] sm:$0xff]  ;;  %v3132_v51 = vld [vmem:[%s4074_s0] sm:$0xff] }
  0x12   :  { %136 = vmatprep.subr.mxu0 %v3024_v33  ;;  %207 = vmatprep.subr.mxu1 %v3029_v34  ;;  %v3137_v52 = vld [vmem:[%s4074_s0 + $0x10] sm:$0xff]  ;;  %v90_v53 = vld [vmem:[%s4075_s1] sm:$0xf]  ;;  %v2630_v54 = vld [vmem:[%s4075_s1 + $0x4] sm:$0xf] }
  0x13   :  { %137 = vmatpush1.msra.mxu0 %v3036_v35  ;;  %208 = vmatpush1.msra.mxu1 %v3041_v36  ;;  %v2639_v55 = vld [vmem:[%s4075_s1 + $0x8] sm:$0xf]  ;;  %v91_v56 = vld [vmem:[%s4076_s2] sm:$0xf]  ;;  %v2648_v58 = vld [vmem:[%s4075_s1 + $0xc] sm:$0xf] }
  0x14   :  { %138 = vmatprep.subr.mxu0 %v3048_v37  ;;  %209 = vmatprep.subr.mxu1 %v3053_v38  ;;  %v2631_v59 = vld [vmem:[%s4076_s2 + $0x4] sm:$0xf]  ;;  %v2657_v60 = vld [vmem:[%s4075_s1 + $0x10] sm:$0xf]  ;;  %v2640_v61 = vld [vmem:[%s4076_s2 + $0x8] sm:$0xf] }
  0x15   :  { %139 = vmatpush1.msra.mxu0 %v3060_v39  ;;  %210 = vmatpush1.msra.mxu1 %v3065_v40  ;;  %v2666_v62 = vld [vmem:[%s4075_s1 + $0x14] sm:$0xf]  ;;  %v2649_v63 = vld [vmem:[%s4076_s2 + $0xc] sm:$0xf] }
  0x16   :  { %140 = vmatprep.subr.mxu0 %v3072_v41  ;;  %211 = vmatprep.subr.mxu1 %v3077_v42 }
  0x17   :  { %141 = vmatpush1.msra.mxu0 %v3084_v43  ;;  %212 = vmatpush1.msra.mxu1 %v3089_v44 }
  0x18   :  { %142 = vmatprep.subr.mxu0 %v3096_v45  ;;  %213 = vmatprep.subr.mxu1 %v3101_v46 }
  0x19   :  { %143 = vmatpush1.msra.mxu0 %v3108_v47  ;;  %214 = vmatpush1.msra.mxu1 %v3113_v48 }
  0x1a   :  { %144 = vmatprep.subr.mxu0 %v3120_v49  ;;  %215 = vmatprep.subr.mxu1 %v3125_v50 }
  0x1b   :  { %145 = vmatpush1.msra.mxu0 %v3132_v51  ;;  %216 = vmatpush1.msra.mxu1 %v3137_v52 }
  0x1c   :  { %2626 = vmatmul.mubr.msk.f32.vlgmr.msra.gmra.mxu0 %vm97_vm1, %v90_v53  ;;  %2632 = vmatprep.subr.msk.mxu0 %vm101_vm0, %v2830_v0 }
  0x1d   :  { %2635 = vmatprep.subr.msk.mxu1 %vm101_vm0, %v2835_v1  ;;  %2629 = vmatmul.mubr.msk.f32.vlgmr.msra.gmra.mxu1 %vm97_vm1, %v90_v53  ;;  %v2675_v53 = vld [vmem:[%s4075_s1 + $0x18] sm:$0xf] }
  0x1e   :  { %2633 = vmatpush1.msk.msra.mxu0 %vm101_vm0, %v2840_v2  ;;  %2636 = vmatpush1.msk.msra.mxu1 %vm101_vm0, %v2851_v4 }
  0x1f   :  { %306 = vmatprep.subr.mxu0 %v2856_v5  ;;  %377 = vmatprep.subr.mxu1 %v2861_v6 }
  0x20   :  { %307 = vmatpush1.msra.mxu0 %v2870_v7  ;;  %378 = vmatpush1.msra.mxu1 %v2875_v8 }
  0x21   :  { %308 = vmatprep.subr.mxu0 %v2880_v9  ;;  %379 = vmatprep.subr.mxu1 %v2887_v10 }
  0x22   :  { %309 = vmatpush1.msra.mxu0 %v2892_v11  ;;  %380 = vmatpush1.msra.mxu1 %v2897_v12 }
  0x23   :  { %310 = vmatprep.subr.mxu0 %v2904_v13  ;;  %381 = vmatprep.subr.mxu1 %v2909_v14 }
  0x24   :  { %311 = vmatpush1.msra.mxu0 %v2916_v15  ;;  %382 = vmatpush1.msra.mxu1 %v2921_v16 }
  0x25   :  { %312 = vmatprep.subr.mxu0 %v2928_v17  ;;  %383 = vmatprep.subr.mxu1 %v2933_v18 }
  0x26   :  { %313 = vmatpush1.msra.mxu0 %v2940_v19  ;;  %384 = vmatpush1.msra.mxu1 %v2945_v20 }
  0x27   :  { %314 = vmatprep.subr.mxu0 %v2952_v21  ;;  %385 = vmatprep.subr.mxu1 %v2957_v22 }
  0x28   :  { %315 = vmatpush1.msra.mxu0 %v2964_v23  ;;  %386 = vmatpush1.msra.mxu1 %v2969_v24 }
  0x29   :  { %316 = vmatprep.subr.mxu0 %v2976_v25  ;;  %387 = vmatprep.subr.mxu1 %v2981_v26 }
  0x2a   :  { %317 = vmatpush1.msra.mxu0 %v2988_v27  ;;  %388 = vmatpush1.msra.mxu1 %v2993_v28 }
  0x2b   :  { %318 = vmatprep.subr.mxu0 %v3000_v29  ;;  %389 = vmatprep.subr.mxu1 %v3005_v30 }
  0x2c   :  { %319 = vmatpush1.msra.mxu0 %v3012_v31  ;;  %390 = vmatpush1.msra.mxu1 %v3017_v32 }
  0x2d   :  { %320 = vmatprep.subr.mxu0 %v3024_v33  ;;  %391 = vmatprep.subr.mxu1 %v3029_v34 }
  0x2e   :  { %321 = vmatpush1.msra.mxu0 %v3036_v35  ;;  %392 = vmatpush1.msra.mxu1 %v3041_v36 }
  0x2f   :  { %322 = vmatprep.subr.mxu0 %v3048_v37  ;;  %393 = vmatprep.subr.mxu1 %v3053_v38 }
  0x30   :  { %323 = vmatpush1.msra.mxu0 %v3060_v39  ;;  %394 = vmatpush1.msra.mxu1 %v3065_v40 }
  0x31   :  { %324 = vmatprep.subr.mxu0 %v3072_v41  ;;  %395 = vmatprep.subr.mxu1 %v3077_v42 }
  0x32   :  { %325 = vmatpush1.msra.mxu0 %v3084_v43  ;;  %396 = vmatpush1.msra.mxu1 %v3089_v44 }
  0x33   :  { %326 = vmatprep.subr.mxu0 %v3096_v45  ;;  %397 = vmatprep.subr.mxu1 %v3101_v46 }
  0x34   :  { %327 = vmatpush1.msra.mxu0 %v3108_v47  ;;  %398 = vmatpush1.msra.mxu1 %v3113_v48 }
  0x35   :  { %328 = vmatprep.subr.mxu0 %v3120_v49  ;;  %399 = vmatprep.subr.mxu1 %v3125_v50 }
  0x36   :  { %329 = vmatpush1.msra.mxu0 %v3132_v51  ;;  %362 = vmatprep.mubr.f32.mxu0 %v2765_v3 }
  0x37   :  { %400 = vmatpush1.msra.mxu1 %v3137_v52  ;;  %433 = vmatprep.mubr.f32.mxu1 %v2765_v3 }
  0x38   :  { %2634 = vmatmul.mubr.msk.f32.vlgmr.msra.gmra.mxu0 %vm97_vm1, %v2630_v54  ;;  %2637 = vmatmul.mubr.msk.f32.vlgmr.msra.gmra.mxu1 %vm97_vm1, %v2630_v54  ;;  %v2763_v54 = vld [vmem:[%s4074_s0 + $0x120] sm:$0xff] }
  0x39   :  { %2641 = vmatprep.subr.msk.mxu0 %vm101_vm0, %v2830_v0  ;;  %2644 = vmatprep.subr.msk.mxu1 %vm101_vm0, %v2835_v1 }
  0x3a   :  { %2642 = vmatpush1.msk.msra.mxu0 %vm101_vm0, %v2840_v2  ;;  %2645 = vmatpush1.msk.msra.mxu1 %vm101_vm0, %v2851_v4 }
  0x3b   :  { %491 = vmatprep.subr.mxu0 %v2856_v5  ;;  %562 = vmatprep.subr.mxu1 %v2861_v6 }
  0x3c   :  { %492 = vmatpush1.msra.mxu0 %v2870_v7  ;;  %563 = vmatpush1.msra.mxu1 %v2875_v8 }
  0x3d   :  { %493 = vmatprep.subr.mxu0 %v2880_v9  ;;  %564 = vmatprep.subr.mxu1 %v2887_v10 }
  0x3e   :  { %494 = vmatpush1.msra.mxu0 %v2892_v11  ;;  %565 = vmatpush1.msra.mxu1 %v2897_v12 }
  0x3f   :  { %495 = vmatprep.subr.mxu0 %v2904_v13  ;;  %566 = vmatprep.subr.mxu1 %v2909_v14 }
  0x40   :  { %496 = vmatpush1.msra.mxu0 %v2916_v15  ;;  %567 = vmatpush1.msra.mxu1 %v2921_v16 }
  0x41   :  { %497 = vmatprep.subr.mxu0 %v2928_v17  ;;  %568 = vmatprep.subr.mxu1 %v2933_v18 }
  0x42   :  { %498 = vmatpush1.msra.mxu0 %v2940_v19  ;;  %569 = vmatpush1.msra.mxu1 %v2945_v20 }
  0x43   :  { %499 = vmatprep.subr.mxu0 %v2952_v21  ;;  %570 = vmatprep.subr.mxu1 %v2957_v22 }
  0x44   :  { %500 = vmatpush1.msra.mxu0 %v2964_v23  ;;  %571 = vmatpush1.msra.mxu1 %v2969_v24 }
  0x45   :  { %501 = vmatprep.subr.mxu0 %v2976_v25  ;;  %572 = vmatprep.subr.mxu1 %v2981_v26 }
  0x46   :  { %502 = vmatpush1.msra.mxu0 %v2988_v27  ;;  %573 = vmatpush1.msra.mxu1 %v2993_v28 }
  0x47   :  { %503 = vmatprep.subr.mxu0 %v3000_v29  ;;  %574 = vmatprep.subr.mxu1 %v3005_v30 }
  0x48   :  { %504 = vmatpush1.msra.mxu0 %v3012_v31  ;;  %575 = vmatpush1.msra.mxu1 %v3017_v32 }
  0x49   :  { %505 = vmatprep.subr.mxu0 %v3024_v33  ;;  %576 = vmatprep.subr.mxu1 %v3029_v34 }
  0x4a   :  { %506 = vmatpush1.msra.mxu0 %v3036_v35  ;;  %577 = vmatpush1.msra.mxu1 %v3041_v36 }
  0x4b   :  { %507 = vmatprep.subr.mxu0 %v3048_v37  ;;  %578 = vmatprep.subr.mxu1 %v3053_v38 }
  0x4c   :  { %508 = vmatpush1.msra.mxu0 %v3060_v39  ;;  %579 = vmatpush1.msra.mxu1 %v3065_v40 }
  0x4d   :  { %509 = vmatprep.subr.mxu0 %v3072_v41  ;;  %580 = vmatprep.subr.mxu1 %v3077_v42 }
  0x4e   :  { %510 = vmatpush1.msra.mxu0 %v3084_v43  ;;  %581 = vmatpush1.msra.mxu1 %v3089_v44 }
  0x4f   :  { %511 = vmatprep.subr.mxu0 %v3096_v45  ;;  %582 = vmatprep.subr.mxu1 %v3101_v46 }
  0x50   :  { %512 = vmatpush1.msra.mxu0 %v3108_v47  ;;  %583 = vmatpush1.msra.mxu1 %v3113_v48 }
  0x51   :  { %513 = vmatprep.subr.mxu0 %v3120_v49  ;;  %584 = vmatprep.subr.mxu1 %v3125_v50 }
  0x52   :  { %514 = vmatpush1.msra.mxu0 %v3132_v51  ;;  %547 = vmatprep.mubr.f32.mxu0 %v2765_v3 }
  0x53   :  { %585 = vmatpush1.msra.mxu1 %v3137_v52  ;;  %618 = vmatprep.mubr.f32.mxu1 %v2765_v3 }
  0x54   :  { %2643 = vmatmul.mubr.msk.f32.vlgmr.msra.gmra.mxu0 %vm97_vm1, %v2639_v55  ;;  %2646 = vmatmul.mubr.msk.f32.vlgmr.msra.gmra.mxu1 %vm97_vm1, %v2639_v55  ;;  %v2764_v55 = vld [vmem:[%s4074_s0 + $0x130] sm:$0xff] }
  0x55   :  { %2650 = vmatprep.subr.msk.mxu0 %vm101_vm0, %v2830_v0  ;;  %2653 = vmatprep.subr.msk.mxu1 %vm101_vm0, %v2835_v1 }
  0x56   :  { %2651 = vmatpush1.msk.msra.mxu0 %vm101_vm0, %v2840_v2  ;;  %2654 = vmatpush1.msk.msra.mxu1 %vm101_vm0, %v2851_v4 }
  0x57   :  { %676 = vmatprep.subr.mxu0 %v2856_v5  ;;  %747 = vmatprep.subr.mxu1 %v2861_v6 }
  0x58   :  { %677 = vmatpush1.msra.mxu0 %v2870_v7  ;;  %748 = vmatpush1.msra.mxu1 %v2875_v8 }
  0x59   :  { %678 = vmatprep.subr.mxu0 %v2880_v9  ;;  %749 = vmatprep.subr.mxu1 %v2887_v10 }
  0x5a   :  { %679 = vmatpush1.msra.mxu0 %v2892_v11  ;;  %750 = vmatpush1.msra.mxu1 %v2897_v12 }
  0x5b   :  { %680 = vmatprep.subr.mxu0 %v2904_v13  ;;  %751 = vmatprep.subr.mxu1 %v2909_v14 }
  0x5c   :  { %681 = vmatpush1.msra.mxu0 %v2916_v15  ;;  %752 = vmatpush1.msra.mxu1 %v2921_v16 }
  0x5d   :  { %682 = vmatprep.subr.mxu0 %v2928_v17  ;;  %753 = vmatprep.subr.mxu1 %v2933_v18 }
  0x5e   :  { %683 = vmatpush1.msra.mxu0 %v2940_v19  ;;  %754 = vmatpush1.msra.mxu1 %v2945_v20 }
  0x5f   :  { %684 = vmatprep.subr.mxu0 %v2952_v21  ;;  %755 = vmatprep.subr.mxu1 %v2957_v22 }
  0x60   :  { %685 = vmatpush1.msra.mxu0 %v2964_v23  ;;  %756 = vmatpush1.msra.mxu1 %v2969_v24 }
  0x61   :  { %686 = vmatprep.subr.mxu0 %v2976_v25  ;;  %757 = vmatprep.subr.mxu1 %v2981_v26 }
  0x62   :  { %687 = vmatpush1.msra.mxu0 %v2988_v27  ;;  %758 = vmatpush1.msra.mxu1 %v2993_v28 }
  0x63   :  { %688 = vmatprep.subr.mxu0 %v3000_v29  ;;  %759 = vmatprep.subr.mxu1 %v3005_v30 }
  0x64   :  { %689 = vmatpush1.msra.mxu0 %v3012_v31  ;;  %760 = vmatpush1.msra.mxu1 %v3017_v32 }
  0x65   :  { %690 = vmatprep.subr.mxu0 %v3024_v33  ;;  %761 = vmatprep.subr.mxu1 %v3029_v34 }
  0x66   :  { %2743 = vset.pattern.permute.xlu0 %v2766_v57  ;;  %691 = vmatpush1.msra.mxu0 %v3036_v35 }
  0x67   :  { %762 = vmatpush1.msra.mxu1 %v3041_v36  ;;  %94 = vperm.xlu0 %2743, %v91_v56   ;;  %v3754_v56 = vld [vmem:[%s4078_s3 + $0xc] sm:$0xf] }
  0x68   :  { %692 = vmatprep.subr.mxu0 %v3048_v37  ;;  %763 = vmatprep.subr.mxu1 %v3053_v38 }
  0x69   :  { %693 = vmatpush1.msra.mxu0 %v3060_v39  ;;  %764 = vmatpush1.msra.mxu1 %v3065_v40 }
  0x6a   :  { %694 = vmatprep.subr.mxu0 %v3072_v41  ;;  %765 = vmatprep.subr.mxu1 %v3077_v42 }
  0x6b   :  { %695 = vmatpush1.msra.mxu0 %v3084_v43  ;;  %766 = vmatpush1.msra.mxu1 %v3089_v44 }
  0x6c   :  { %696 = vmatprep.subr.mxu0 %v3096_v45  ;;  %767 = vmatprep.subr.mxu1 %v3101_v46 }
  0x6d   :  { %697 = vmatpush1.msra.mxu0 %v3108_v47  ;;  %768 = vmatpush1.msra.mxu1 %v3113_v48 }
  0x6e   :  { %698 = vmatprep.subr.mxu0 %v3120_v49  ;;  %769 = vmatprep.subr.mxu1 %v3125_v50 }
  0x6f   :  { %699 = vmatpush1.msra.mxu0 %v3132_v51  ;;  %732 = vmatprep.mubr.f32.mxu0 %v2765_v3 }
  0x70   :  { %770 = vmatpush1.msra.mxu1 %v3137_v52  ;;  %803 = vmatprep.mubr.f32.mxu1 %v2765_v3 }
  0x71   :  { %2652 = vmatmul.mubr.msk.f32.vlgmr.msra.gmra.mxu0 %vm97_vm1, %v2648_v58  ;;  %2655 = vmatmul.mubr.msk.f32.vlgmr.msra.gmra.mxu1 %vm97_vm1, %v2648_v58 }
  0x72   :  { %2659 = vmatprep.subr.msk.mxu0 %vm101_vm0, %v2830_v0  ;;  %2662 = vmatprep.subr.msk.mxu1 %vm101_vm0, %v2835_v1 }
  0x73   :  { %2660 = vmatpush1.msk.msra.mxu0 %vm101_vm0, %v2840_v2  ;;  %2663 = vmatpush1.msk.msra.mxu1 %vm101_vm0, %v2851_v4 }
  0x74   :  { %861 = vmatprep.subr.mxu0 %v2856_v5  ;;  %932 = vmatprep.subr.mxu1 %v2861_v6 }
  0x75   :  { %862 = vmatpush1.msra.mxu0 %v2870_v7  ;;  %933 = vmatpush1.msra.mxu1 %v2875_v8 }
  0x76   :  { %863 = vmatprep.subr.mxu0 %v2880_v9  ;;  %934 = vmatprep.subr.mxu1 %v2887_v10 }
  0x77   :  { %864 = vmatpush1.msra.mxu0 %v2892_v11  ;;  %935 = vmatpush1.msra.mxu1 %v2897_v12 }
  0x78   :  { %865 = vmatprep.subr.mxu0 %v2904_v13  ;;  %936 = vmatprep.subr.mxu1 %v2909_v14 }
  0x79   :  { %866 = vmatpush1.msra.mxu0 %v2916_v15  ;;  %937 = vmatpush1.msra.mxu1 %v2921_v16 }
  0x7a   :  { %867 = vmatprep.subr.mxu0 %v2928_v17  ;;  %938 = vmatprep.subr.mxu1 %v2933_v18 }
  0x7b   :  { %868 = vmatpush1.msra.mxu0 %v2940_v19  ;;  %939 = vmatpush1.msra.mxu1 %v2945_v20 }
  0x7c   :  { %869 = vmatprep.subr.mxu0 %v2952_v21  ;;  %940 = vmatprep.subr.mxu1 %v2957_v22 }
  0x7d   :  { %870 = vmatpush1.msra.mxu0 %v2964_v23  ;;  %941 = vmatpush1.msra.mxu1 %v2969_v24 }
  0x7e   :  { %871 = vmatprep.subr.mxu0 %v2976_v25  ;;  %942 = vmatprep.subr.mxu1 %v2981_v26 }
  0x7f   :  { %872 = vmatpush1.msra.mxu0 %v2988_v27  ;;  %943 = vmatpush1.msra.mxu1 %v2993_v28 }
  0x80   :  { %873 = vmatprep.subr.mxu0 %v3000_v29  ;;  %944 = vmatprep.subr.mxu1 %v3005_v30 }
  0x81   :  { %874 = vmatpush1.msra.mxu0 %v3012_v31  ;;  %945 = vmatpush1.msra.mxu1 %v3017_v32 }
  0x82   :  { %875 = vmatprep.subr.mxu0 %v3024_v33  ;;  %946 = vmatprep.subr.mxu1 %v3029_v34 }
  0x83   :  { %292 = vperm.xlu0 %2743, %v2631_v59   ;;  %876 = vmatpush1.msra.mxu0 %v3036_v35 }
  0x84   :  { %947 = vmatpush1.msra.mxu1 %v3041_v36  ;;  %877 = vmatprep.subr.mxu0 %v3048_v37 }
  0x85   :  { %948 = vmatprep.subr.mxu1 %v3053_v38  ;;  %878 = vmatpush1.msra.mxu0 %v3060_v39 }
  0x86   :  { %949 = vmatpush1.msra.mxu1 %v3065_v40  ;;  %879 = vmatprep.subr.mxu0 %v3072_v41 }
  0x87   :  { %950 = vmatprep.subr.mxu1 %v3077_v42  ;;  %880 = vmatpush1.msra.mxu0 %v3084_v43 }
  0x88   :  { %951 = vmatpush1.msra.mxu1 %v3089_v44  ;;  %881 = vmatprep.subr.mxu0 %v3096_v45 }
  0x89   :  { %952 = vmatprep.subr.mxu1 %v3101_v46  ;;  %882 = vmatpush1.msra.mxu0 %v3108_v47 }
  0x8a   :  { %953 = vmatpush1.msra.mxu1 %v3113_v48  ;;  %883 = vmatprep.subr.mxu0 %v3120_v49 }
  0x8b   :  { %954 = vmatprep.subr.mxu1 %v3125_v50  ;;  %884 = vmatpush1.msra.mxu0 %v3132_v51 }
  0x8c   :  { %917 = vmatprep.mubr.f32.mxu0 %v2765_v3  ;;  %955 = vmatpush1.msra.mxu1 %v3137_v52 }
  0x8d   :  { %988 = vmatprep.mubr.f32.mxu1 %v2765_v3  ;;  %2661 = vmatmul.mubr.msk.f32.vlgmr.msra.gmra.mxu0 %vm97_vm1, %v2657_v60 }
  0x8e   :  { %2664 = vmatmul.mubr.msk.f32.vlgmr.msra.gmra.mxu1 %vm97_vm1, %v2657_v60  ;;  %2668 = vmatprep.subr.msk.mxu0 %vm101_vm0, %v2830_v0 }
  0x8f   :  { %2671 = vmatprep.subr.msk.mxu1 %vm101_vm0, %v2835_v1  ;;  %2669 = vmatpush1.msk.msra.mxu0 %vm101_vm0, %v2840_v2 }
  0x90   :  { %2672 = vmatpush1.msk.msra.mxu1 %vm101_vm0, %v2851_v4  ;;  %1046 = vmatprep.subr.mxu0 %v2856_v5 }
  0x91   :  { %1117 = vmatprep.subr.mxu1 %v2861_v6  ;;  %1047 = vmatpush1.msra.mxu0 %v2870_v7 }
  0x92   :  { %1118 = vmatpush1.msra.mxu1 %v2875_v8  ;;  %1048 = vmatprep.subr.mxu0 %v2880_v9 }
  0x93   :  { %1119 = vmatprep.subr.mxu1 %v2887_v10  ;;  %1049 = vmatpush1.msra.mxu0 %v2892_v11 }
  0x94   :  { %1120 = vmatpush1.msra.mxu1 %v2897_v12  ;;  %1050 = vmatprep.subr.mxu0 %v2904_v13 }
  0x95   :  { %1121 = vmatprep.subr.mxu1 %v2909_v14  ;;  %1051 = vmatpush1.msra.mxu0 %v2916_v15 }
  0x96   :  { %1122 = vmatpush1.msra.mxu1 %v2921_v16  ;;  %1052 = vmatprep.subr.mxu0 %v2928_v17 }
  0x97   :  { %1123 = vmatprep.subr.mxu1 %v2933_v18  ;;  %1053 = vmatpush1.msra.mxu0 %v2940_v19 }
  0x98   :  { %1124 = vmatpush1.msra.mxu1 %v2945_v20  ;;  %1054 = vmatprep.subr.mxu0 %v2952_v21 }
  0x99   :  { %1125 = vmatprep.subr.mxu1 %v2957_v22  ;;  %1055 = vmatpush1.msra.mxu0 %v2964_v23 }
  0x9a   :  { %1126 = vmatpush1.msra.mxu1 %v2969_v24  ;;  %1056 = vmatprep.subr.mxu0 %v2976_v25 }
  0x9b   :  { %1127 = vmatprep.subr.mxu1 %v2981_v26  ;;  %1057 = vmatpush1.msra.mxu0 %v2988_v27 }
  0x9c   :  { %1128 = vmatpush1.msra.mxu1 %v2993_v28  ;;  %1058 = vmatprep.subr.mxu0 %v3000_v29 }
  0x9d   :  { %1129 = vmatprep.subr.mxu1 %v3005_v30  ;;  %1059 = vmatpush1.msra.mxu0 %v3012_v31 }
  0x9e   :  { %1130 = vmatpush1.msra.mxu1 %v3017_v32  ;;  %2744 = vset.pattern.permute.xlu1 %v2766_v57 }
  0x9f   :  { %1060 = vmatprep.subr.mxu0 %v3024_v33  ;;  %1131 = vmatprep.subr.mxu1 %v3029_v34 }
  0xa0   :  { %477 = vperm.xlu1 %2744, %v2640_v61   ;;  %1061 = vmatpush1.msra.mxu0 %v3036_v35 }
  0xa1   :  { %1132 = vmatpush1.msra.mxu1 %v3041_v36  ;;  %1062 = vmatprep.subr.mxu0 %v3048_v37 }
  0xa2   :  { %1133 = vmatprep.subr.mxu1 %v3053_v38  ;;  %1063 = vmatpush1.msra.mxu0 %v3060_v39 }
  0xa3   :  { %1134 = vmatpush1.msra.mxu1 %v3065_v40  ;;  %1064 = vmatprep.subr.mxu0 %v3072_v41 }
  0xa4   :  { %1135 = vmatprep.subr.mxu1 %v3077_v42  ;;  %1065 = vmatpush1.msra.mxu0 %v3084_v43 }
  0xa5   :  { %1136 = vmatpush1.msra.mxu1 %v3089_v44  ;;  %1066 = vmatprep.subr.mxu0 %v3096_v45 }
  0xa6   :  { %1137 = vmatprep.subr.mxu1 %v3101_v46  ;;  %1067 = vmatpush1.msra.mxu0 %v3108_v47 }
  0xa7   :  { %1138 = vmatpush1.msra.mxu1 %v3113_v48  ;;  %1068 = vmatprep.subr.mxu0 %v3120_v49 }
  0xa8   :  { %1139 = vmatprep.subr.mxu1 %v3125_v50  ;;  %1069 = vmatpush1.msra.mxu0 %v3132_v51 }
  0xa9   :  { %1102 = vmatprep.mubr.f32.mxu0 %v2765_v3  ;;  %1140 = vmatpush1.msra.mxu1 %v3137_v52 }
  0xaa   :  { %1173 = vmatprep.mubr.f32.mxu1 %v2765_v3  ;;  %2670 = vmatmul.mubr.msk.f32.vlgmr.msra.gmra.mxu0 %vm97_vm1, %v2666_v62 }
  0xab   :  { %2673 = vmatmul.mubr.msk.f32.vlgmr.msra.gmra.mxu1 %vm97_vm1, %v2666_v62  ;;  %2677 = vmatprep.subr.msk.mxu0 %vm101_vm0, %v2830_v0 }
  0xac   :  { %2680 = vmatprep.subr.msk.mxu1 %vm101_vm0, %v2835_v1  ;;  %2678 = vmatpush1.msk.msra.mxu0 %vm101_vm0, %v2840_v2 }
  0xad   :  { %2681 = vmatpush1.msk.msra.mxu1 %vm101_vm0, %v2851_v4  ;;  %1231 = vmatprep.subr.mxu0 %v2856_v5 }
  0xae   :  { %1302 = vmatprep.subr.mxu1 %v2861_v6  ;;  %1232 = vmatpush1.msra.mxu0 %v2870_v7 }
  0xaf   :  { %1303 = vmatpush1.msra.mxu1 %v2875_v8  ;;  %1233 = vmatprep.subr.mxu0 %v2880_v9 }
  0xb0   :  { %1304 = vmatprep.subr.mxu1 %v2887_v10  ;;  %1234 = vmatpush1.msra.mxu0 %v2892_v11 }
  0xb1   :  { %1305 = vmatpush1.msra.mxu1 %v2897_v12  ;;  %1235 = vmatprep.subr.mxu0 %v2904_v13 }
  0xb2   :  { %1306 = vmatprep.subr.mxu1 %v2909_v14  ;;  %1236 = vmatpush1.msra.mxu0 %v2916_v15 }
  0xb3   :  { %1307 = vmatpush1.msra.mxu1 %v2921_v16  ;;  %1237 = vmatprep.subr.mxu0 %v2928_v17 }
  0xb4   :  { %1308 = vmatprep.subr.mxu1 %v2933_v18  ;;  %1238 = vmatpush1.msra.mxu0 %v2940_v19 }
  0xb5   :  { %1309 = vmatpush1.msra.mxu1 %v2945_v20  ;;  %1239 = vmatprep.subr.mxu0 %v2952_v21 }
  0xb6   :  { %1310 = vmatprep.subr.mxu1 %v2957_v22  ;;  %1240 = vmatpush1.msra.mxu0 %v2964_v23 }
  0xb7   :  { %1311 = vmatpush1.msra.mxu1 %v2969_v24  ;;  %1241 = vmatprep.subr.mxu0 %v2976_v25 }
  0xb8   :  { %1312 = vmatprep.subr.mxu1 %v2981_v26  ;;  %1242 = vmatpush1.msra.mxu0 %v2988_v27 }
  0xb9   :  { %1313 = vmatpush1.msra.mxu1 %v2993_v28  ;;  %1243 = vmatprep.subr.mxu0 %v3000_v29 }
  0xba   :  { %1314 = vmatprep.subr.mxu1 %v3005_v30  ;;  %1244 = vmatpush1.msra.mxu0 %v3012_v31 }
  0xbb   :  { %1315 = vmatpush1.msra.mxu1 %v3017_v32  ;;  %1245 = vmatprep.subr.mxu0 %v3024_v33 }
  0xbc   :  { %1316 = vmatprep.subr.mxu1 %v3029_v34  ;;  %662 = vperm.xlu1 %2744, %v2649_v63  }
  0xbd   :  { %1246 = vmatpush1.msra.mxu0 %v3036_v35  ;;  %1317 = vmatpush1.msra.mxu1 %v3041_v36 }
  0xbe   :  { %1247 = vmatprep.subr.mxu0 %v3048_v37  ;;  %1318 = vmatprep.subr.mxu1 %v3053_v38 }
  0xbf   :  { %1248 = vmatpush1.msra.mxu0 %v3060_v39  ;;  %1319 = vmatpush1.msra.mxu1 %v3065_v40 }
  0xc0   :  { %1249 = vmatprep.subr.mxu0 %v3072_v41  ;;  %1320 = vmatprep.subr.mxu1 %v3077_v42 }
  0xc1   :  { %1250 = vmatpush1.msra.mxu0 %v3084_v43  ;;  %1321 = vmatpush1.msra.mxu1 %v3089_v44 }
  0xc2   :  { %1251 = vmatprep.subr.mxu0 %v3096_v45  ;;  %1322 = vmatprep.subr.mxu1 %v3101_v46 }
  0xc3   :  { %1252 = vmatpush1.msra.mxu0 %v3108_v47  ;;  %1323 = vmatpush1.msra.mxu1 %v3113_v48 }
  0xc4   :  { %1253 = vmatprep.subr.mxu0 %v3120_v49  ;;  %1324 = vmatprep.subr.mxu1 %v3125_v50 }
  0xc5   :  { %1254 = vmatpush1.msra.mxu0 %v3132_v51  ;;  %1287 = vmatprep.mubr.f32.mxu0 %v2765_v3 }
  0xc6   :  { %1325 = vmatpush1.msra.mxu1 %v3137_v52  ;;  %1358 = vmatprep.mubr.f32.mxu1 %v2765_v3 }
  0xc7   :  { %2679 = vmatmul.mubr.msk.f32.vlgmr.msra.gmra.mxu0 %vm97_vm1, %v2675_v53  ;;  %2682 = vmatmul.mubr.msk.f32.vlgmr.msra.gmra.mxu1 %vm97_vm1, %v2675_v53 }
  0xc8   :  { %2686 = vmatprep.subr.msk.mxu0 %vm101_vm0, %v2830_v0  ;;  %2689 = vmatprep.subr.msk.mxu1 %vm101_vm0, %v2835_v1  ;;  %v2658_v0 = vld [vmem:[%s4076_s2 + $0x10] sm:$0xf]  ;;  %v2684_v1 = vld [vmem:[%s4075_s1 + $0x1c] sm:$0xf] }
  0xc9   :  { %2687 = vmatpush1.msk.msra.mxu0 %vm101_vm0, %v2840_v2  ;;  %2690 = vmatpush1.msk.msra.mxu1 %vm101_vm0, %v2851_v4  ;;  %v2749_v2 = vld [vmem:[%s4074_s0 + $0x188] sm:$0xf]  ;;  %v2750_v4 = vld [vmem:[%s4074_s0 + $0x198] sm:$0xf] }
  0xca   :  { %1416 = vmatprep.subr.mxu0 %v2856_v5  ;;  %1487 = vmatprep.subr.mxu1 %v2861_v6  ;;  %v2751_v5 = vld [vmem:[%s4074_s0 + $0x180] sm:$0xf]  ;;  %v2752_v6 = vld [vmem:[%s4074_s0 + $0x190] sm:$0xf] }
  0xcb   :  { %1417 = vmatpush1.msra.mxu0 %v2870_v7  ;;  %1488 = vmatpush1.msra.mxu1 %v2875_v8  ;;  %v2753_v7 = vld [vmem:[%s4074_s0 + $0x168] sm:$0xff]  ;;  %v2754_v8 = vld [vmem:[%s4074_s0 + $0x178] sm:$0xff] }
  0xcc   :  { %1418 = vmatprep.subr.mxu0 %v2880_v9  ;;  %1489 = vmatprep.subr.mxu1 %v2887_v10  ;;  %v2755_v9 = vld [vmem:[%s4074_s0 + $0x160] sm:$0xff]  ;;  %v2756_v10 = vld [vmem:[%s4074_s0 + $0x170] sm:$0xff] }
  0xcd   :  { %1419 = vmatpush1.msra.mxu0 %v2892_v11  ;;  %1490 = vmatpush1.msra.mxu1 %v2897_v12  ;;  %v2757_v11 = vld [vmem:[%s4074_s0 + $0x148] sm:$0xff]  ;;  %v2758_v12 = vld [vmem:[%s4074_s0 + $0x158] sm:$0xff] }
  0xce   :  { %1420 = vmatprep.subr.mxu0 %v2904_v13  ;;  %1491 = vmatprep.subr.mxu1 %v2909_v14  ;;  %v2759_v13 = vld [vmem:[%s4074_s0 + $0x140] sm:$0xff]  ;;  %v2760_v14 = vld [vmem:[%s4074_s0 + $0x150] sm:$0xff] }
  0xcf   :  { %1421 = vmatpush1.msra.mxu0 %v2916_v15  ;;  %1492 = vmatpush1.msra.mxu1 %v2921_v16  ;;  %v2761_v15 = vld [vmem:[%s4074_s0 + $0x128] sm:$0xff]  ;;  %v2762_v16 = vld [vmem:[%s4074_s0 + $0x138] sm:$0xff] }
  0xd0   :  { %1422 = vmatprep.subr.mxu0 %v2928_v17  ;;  %1493 = vmatprep.subr.mxu1 %v2933_v18 }
  0xd1   :  { %1423 = vmatpush1.msra.mxu0 %v2940_v19  ;;  %1494 = vmatpush1.msra.mxu1 %v2945_v20 }
  0xd2   :  { %1424 = vmatprep.subr.mxu0 %v2952_v21  ;;  %1495 = vmatprep.subr.mxu1 %v2957_v22 }
  0xd3   :  { %1425 = vmatpush1.msra.mxu0 %v2964_v23  ;;  %1496 = vmatpush1.msra.mxu1 %v2969_v24 }
  0xd4   :  { %1426 = vmatprep.subr.mxu0 %v2976_v25  ;;  %1497 = vmatprep.subr.mxu1 %v2981_v26 }
  0xd5   :  { %1427 = vmatpush1.msra.mxu0 %v2988_v27  ;;  %1498 = vmatpush1.msra.mxu1 %v2993_v28 }
  0xd6   :  { %1428 = vmatprep.subr.mxu0 %v3000_v29  ;;  %1499 = vmatprep.subr.mxu1 %v3005_v30 }
  0xd7   :  { %1429 = vmatpush1.msra.mxu0 %v3012_v31  ;;  %1500 = vmatpush1.msra.mxu1 %v3017_v32 }
  0xd8   :  { %1430 = vmatprep.subr.mxu0 %v3024_v33  ;;  %1501 = vmatprep.subr.mxu1 %v3029_v34 }
  0xd9   :  { %847 = vperm.xlu0 %2743, %v2658_v0   ;;  %1431 = vmatpush1.msra.mxu0 %v3036_v35 }
  0xda   :  { %1502 = vmatpush1.msra.mxu1 %v3041_v36  ;;  %1432 = vmatprep.subr.mxu0 %v3048_v37 }
  0xdb   :  { %1503 = vmatprep.subr.mxu1 %v3053_v38  ;;  %1433 = vmatpush1.msra.mxu0 %v3060_v39 }
  0xdc   :  { %1504 = vmatpush1.msra.mxu1 %v3065_v40  ;;  %1434 = vmatprep.subr.mxu0 %v3072_v41 }
  0xdd   :  { %1505 = vmatprep.subr.mxu1 %v3077_v42  ;;  %1435 = vmatpush1.msra.mxu0 %v3084_v43 }
  0xde   :  { %1506 = vmatpush1.msra.mxu1 %v3089_v44  ;;  %1436 = vmatprep.subr.mxu0 %v3096_v45 }
  0xdf   :  { %1507 = vmatprep.subr.mxu1 %v3101_v46  ;;  %1437 = vmatpush1.msra.mxu0 %v3108_v47 }
  0xe0   :  { %1508 = vmatpush1.msra.mxu1 %v3113_v48  ;;  %1438 = vmatprep.subr.mxu0 %v3120_v49 }
  0xe1   :  { %1509 = vmatprep.subr.mxu1 %v3125_v50  ;;  %1439 = vmatpush1.msra.mxu0 %v3132_v51 }
  0xe2   :  { %1472 = vmatprep.mubr.f32.mxu0 %v2765_v3  ;;  %1510 = vmatpush1.msra.mxu1 %v3137_v52 }
  0xe3   :  { %1543 = vmatprep.mubr.f32.mxu1 %v2765_v3  ;;  %2688 = vmatmul.mubr.msk.f32.vlgmr.msra.gmra.mxu0 %vm97_vm1, %v2684_v1 }
  0xe4   :  { %2691 = vmatmul.mubr.msk.f32.vlgmr.msra.gmra.mxu1 %vm97_vm1, %v2684_v1  ;;  %2695 = vmatprep.subr.msk.mxu0 %vm101_vm0, %v2749_v2 }
  0xe5   :  { %2698 = vmatprep.subr.msk.mxu1 %vm101_vm0, %v2750_v4  ;;  %2696 = vmatpush1.msk.msra.mxu0 %vm101_vm0, %v2751_v5 }
  0xe6   :  { %2699 = vmatpush1.msk.msra.mxu1 %vm101_vm0, %v2752_v6  ;;  %1601 = vmatprep.subr.mxu0 %v2753_v7 }
  0xe7   :  { %1672 = vmatprep.subr.mxu1 %v2754_v8  ;;  %1602 = vmatpush1.msra.mxu0 %v2755_v9  ;;  %v3779_v9 = vld [vmem:[%s4078_s3 + $0x10] sm:$0xf] }
  0xe8   :  { %1673 = vmatpush1.msra.mxu1 %v2756_v10  ;;  %1603 = vmatprep.subr.mxu0 %v2757_v11 }
  0xe9   :  { %1674 = vmatprep.subr.mxu1 %v2758_v12  ;;  %1604 = vmatpush1.msra.mxu0 %v2759_v13 }
  0xea   :  { %1675 = vmatpush1.msra.mxu1 %v2760_v14  ;;  %1605 = vmatprep.subr.mxu0 %v2761_v15 }
  0xeb   :  { %1676 = vmatprep.subr.mxu1 %v2762_v16  ;;  %1606 = vmatpush1.msra.mxu0 %v2763_v54 }
  0xec   :  { %1677 = vmatpush1.msra.mxu1 %v2764_v55  ;;  %1607 = vmatprep.subr.mxu0 %v2928_v17  ;;  %v2667_v17 = vld [vmem:[%s4076_s2 + $0x14] sm:$0xf] }
  0xed   :  { %1678 = vmatprep.subr.mxu1 %v2933_v18  ;;  %1608 = vmatpush1.msra.mxu0 %v2940_v19  ;;  %v2693_v18 = vld [vmem:[%s4075_s1 + $0x20] sm:$0xf]  ;;  %v2676_v19 = vld [vmem:[%s4076_s2 + $0x18] sm:$0xf] }
  0xee   :  { %1679 = vmatpush1.msra.mxu1 %v2945_v20  ;;  %1609 = vmatprep.subr.mxu0 %v2952_v21  ;;  %v2685_v20 = vld [vmem:[%s4076_s2 + $0x1c] sm:$0xf]  ;;  %v2694_v21 = vld [vmem:[%s4076_s2 + $0x20] sm:$0xf] }
  0xef   :  { %1680 = vmatprep.subr.mxu1 %v2957_v22  ;;  %1610 = vmatpush1.msra.mxu0 %v2964_v23  ;;  %v1766_v22 = vld [vmem:[%s4077_s4] sm:$0xf]  ;;  %v180_v23 = vpop.f32.mrf.mxu0 }
  0xf0   :  { %1681 = vmatpush1.msra.mxu1 %v2969_v24  ;;  %1611 = vmatprep.subr.mxu0 %v2976_v25  ;;  %v251_v24 = vpop.f32.mrf.mxu1 }
  0xf1   :  { %1682 = vmatprep.subr.mxu1 %v2981_v26  ;;  %1612 = vmatpush1.msra.mxu0 %v2988_v27  ;;  %v182_v25 = vpop.f32.mrf.mxu0 }
  0xf2   :  { %1683 = vmatpush1.msra.mxu1 %v2993_v28  ;;  %1613 = vmatprep.subr.mxu0 %v3000_v29  ;;  %v253_v26 = vpop.f32.mrf.mxu1 }
  0xf3   :  { %1684 = vmatprep.subr.mxu1 %v3005_v30  ;;  %1614 = vmatpush1.msra.mxu0 %v3012_v31  ;;  %v258_v31 = vlaneseq }
  0xf4   :  { %1685 = vmatpush1.msra.mxu1 %v3017_v32  ;;  %1615 = vmatprep.subr.mxu0 %v3024_v33 }
  0xf5   :  { %1686 = vmatprep.subr.mxu1 %v3029_v34  ;;  %1032 = vperm.xlu1 %2744, %v2667_v17   ;;  %v259_v34 = vshrl.u32 %v258_v31, 7 }
  0xf6   :  { %1616 = vmatpush1.msra.mxu0 %v3036_v35  ;;  %1687 = vmatpush1.msra.mxu1 %v3041_v36 }
  0xf7   :  { %1617 = vmatprep.subr.mxu0 %v3048_v37  ;;  %1688 = vmatprep.subr.mxu1 %v3053_v38 }
  0xf8   :  { %1618 = vmatpush1.msra.mxu0 %v3060_v39  ;;  %1689 = vmatpush1.msra.mxu1 %v3065_v40  ;;  %v364_v27 = vpop.f32.mrf.mxu0  ;;  %v435_v28 = vpop.f32.mrf.mxu1  ;;  %v3724_v39 = vsub.s32 1, %v259_v34  ;;  %v3726_v40 = vsub.s32 2, %v259_v34 }
  0xf9   :  { %1619 = vmatprep.subr.mxu0 %v3072_v41  ;;  %1690 = vmatprep.subr.mxu1 %v3077_v42  ;;  %v3728_v41 = vsub.s32 3, %v259_v34  ;;  %v3730_v42 = vsub.s32 0, %v259_v34 }
  0xfa   :  { %1620 = vmatpush1.msra.mxu0 %v3084_v43  ;;  %1691 = vmatpush1.msra.mxu1 %v3089_v44  ;;  %v366_v29 = vpop.f32.mrf.mxu0  ;;  %v437_v30 = vpop.f32.mrf.mxu1  ;;  %v256_v44 = vld [vmem:[%s4078_s3] sm:$0xf]  ;;  %v824_v8 = vrot.slane %v3754_v56, %v3726_v40  ;;  %v820_v12 = vrot.slane %v3754_v56, %v3724_v39 }
  0xfb   :  { %1621 = vmatprep.subr.mxu0 %v3096_v45  ;;  %1692 = vmatprep.subr.mxu1 %v3101_v46  ;;  %v95_v43 = vpop.permute.xlu0 %94  ;;  %v2638_v45 = vld [vmem:[%s4078_s3 + $0x4] sm:$0xf]  ;;  %v816_v7 = vrot.slane %v3754_v56, %v3730_v42  ;;  %v828_v13 = vrot.slane %v3754_v56, %v3728_v41 }
  0xfc   :  { %1622 = vmatpush1.msra.mxu0 %v3108_v47  ;;  %1693 = vmatpush1.msra.mxu1 %v3113_v48  ;;  %v3745_v48 = vld [vmem:[%s4078_s3 + $0x8] sm:$0xf]  ;;  %v446_v60 = vrot.slane %v2638_v45, %v3730_v42  ;;  %v454_v61 = vrot.slane %v2638_v45, %v3726_v40  ;;  %v450_v62 = vrot.slane %v2638_v45, %v3724_v39 }
  0xfd   :  { %1623 = vmatprep.subr.mxu0 %v3120_v49  ;;  %1694 = vmatprep.subr.mxu1 %v3125_v50  ;;  %v265_v49 = vrot.slane %v256_v44, %v3724_v39  ;;  %v269_v50 = vrot.slane %v256_v44, %v3726_v40  ;;  %v458_v63 = vrot.slane %v2638_v45, %v3728_v41 }
  0xfe   :  { %1624 = vmatpush1.msra.mxu0 %v3132_v51  ;;  %1657 = vmatprep.mubr.f32.mxu0 %v2765_v3  ;;  %v273_v51 = vrot.slane %v256_v44, %v3728_v41  ;;  %v631_v53 = vrot.slane %v3745_v48, %v3730_v42  ;;  %v639_v0 = vrot.slane %v3745_v48, %v3726_v40 }
  0xff   :  { %1695 = vmatpush1.msra.mxu1 %v3137_v52  ;;  %1728 = vmatprep.mubr.f32.mxu1 %v2765_v3  ;;  %v261_v52 = vrot.slane %v256_v44, %v3730_v42  ;;  %v293_v59 = vpop.permute.xlu0 %292  ;;  %v635_v1 = vrot.slane %v3745_v48, %v3724_v39  ;;  %v643_v2 = vrot.slane %v3745_v48, %v3728_v41 }
 0x100   :  { %2697 = vmatmul.mubr.msk.f32.vlgmr.msra.gmra.mxu0 %vm97_vm1, %v2693_v18  ;;  %2700 = vmatmul.mubr.msk.f32.vlgmr.msra.gmra.mxu1 %vm97_vm1, %v2693_v18  ;;  %v183_v4 = vadd.f32 %v182_v25, %v95_v43  ;;  %v252_v5 = vadd.f32 %v251_v24, %v95_v43  ;;  %v365_v10 = vadd.f32 %v364_v27, %v293_v59 }
 0x101   :  { %1217 = vperm.xlu0 %2743, %v2676_v19   ;;  %1402 = vperm.xlu1 %2744, %v2685_v20   ;;  %v436_v11 = vadd.f32 %v435_v28, %v293_v59  ;;  %v181_v16 = vadd.f32 %v180_v23, %v95_v43  ;;  %v254_v54 = vadd.f32 %v253_v26, %v95_v43  ;;  %v3800_v28 = vld [vmem:[%s4078_s3 + $0x14] sm:$0xf] }
 0x102   :  { %1921 = vmatprep.mubr.f32.mxu0 %v2765_v3  ;;  %1992 = vmatprep.mubr.f32.mxu1 %v2765_v3  ;;  %v367_v55 = vadd.f32 %v366_v29, %v293_v59  ;;  %v438_v17 = vadd.f32 %v437_v30, %v293_v59  ;;  %v1001_v18 = vrot.slane %v3779_v9, %v3730_v42 }
 0x103   :  { %v1009_v19 = vrot.slane %v3779_v9, %v3726_v40  ;;  %v1005_v20 = vrot.slane %v3779_v9, %v3724_v39  ;;  %v279_v25 = vmul.f32 %v265_v49, %v183_v4  ;;  %v280_v27 = vmul.f32 %v269_v50, %v252_v5 }
 0x104   :  { %v463_v29 = vmul.f32 %v446_v60, %v365_v10  ;;  %v465_v30 = vmul.f32 %v454_v61, %v436_v11  ;;  %v281_v44 = vmul.f32 %v273_v51, %v254_v54  ;;  %v278_v45 = vmul.f32 %v261_v52, %v181_v16  ;;  %v3815_v61 = vld [vmem:[%s4078_s3 + $0x18] sm:$0xf] }
 0x105   :  { %1587 = vperm.xlu0 %2743, %v2694_v21   ;;  %1769 = vperm.xlu1 %2744, %v1766_v22   ;;  %v1013_v21 = vrot.slane %v3779_v9, %v3728_v41  ;;  %v464_v48 = vmul.f32 %v450_v62, %v367_v55  ;;  %v466_v59 = vmul.f32 %v458_v63, %v438_v17 }
 0x106   :  { %v1186_v49 = vrot.slane %v3800_v28, %v3730_v42  ;;  %v1190_v50 = vrot.slane %v3800_v28, %v3724_v39  ;;  %v467_v62 = vadd.f32 %v463_v29, %v278_v45  ;;  %v469_v63 = vadd.f32 %v465_v30, %v280_v27 }
 0x107   :  { %v468_v16 = vadd.f32 %v464_v48, %v279_v25  ;;  %v470_v54 = vadd.f32 %v466_v59, %v281_v44  ;;  %v1379_v55 = vrot.slane %v3815_v61, %v3726_v40  ;;  %v1375_v17 = vrot.slane %v3815_v61, %v3724_v39 }
 0x114   :  { %v549_v32 = vpop.f32.mrf.mxu0  ;;  %v620_v33 = vpop.f32.mrf.mxu1 }
 0x116   :  { %v551_v35 = vpop.f32.mrf.mxu0  ;;  %v622_v36 = vpop.f32.mrf.mxu1 }
 0x11b   :  { %v478_v6 = vpop.permute.xlu1 %477 }
 0x11c   :  { %v550_v23 = vadd.f32 %v549_v32, %v478_v6  ;;  %v621_v26 = vadd.f32 %v620_v33, %v478_v6  ;;  %v552_v31 = vadd.f32 %v551_v35, %v478_v6  ;;  %v623_v34 = vadd.f32 %v622_v36, %v478_v6 }
 0x11d   :  { %v1194_v32 = vrot.slane %v3800_v28, %v3726_v40  ;;  %v1198_v35 = vrot.slane %v3800_v28, %v3728_v41 }
 0x11e   :  { %v648_v36 = vmul.f32 %v631_v53, %v550_v23  ;;  %v650_v60 = vmul.f32 %v639_v0, %v621_v26  ;;  %v649_v5 = vmul.f32 %v635_v1, %v552_v31  ;;  %v651_v6 = vmul.f32 %v643_v2, %v623_v34  ;;  %v3830_v2 = vld [vmem:[%s4078_s3 + $0x1c] sm:$0xf] }
 0x11f   :  { %v1383_v1 = vrot.slane %v3815_v61, %v3728_v41  ;;  %v1560_v56 = vrot.slane %v3830_v2, %v3724_v39 }
 0x120   :  { %v653_v26 = vadd.f32 %v649_v5, %v468_v16  ;;  %v655_v29 = vadd.f32 %v651_v6, %v470_v54 }
 0x131   :  { %v3720_v37 = vpop.f32.mrf.mxu0  ;;  %v3722_v38 = vpop.f32.mrf.mxu1 }
 0x133   :  { %v3738_v46 = vpop.f32.mrf.mxu0  ;;  %v3740_v47 = vpop.f32.mrf.mxu1 }
 0x137   :  { %v663_v43 = vpop.permute.xlu1 %662 }
 0x138   :  { %v735_v51 = vadd.f32 %v3720_v37, %v663_v43  ;;  %v806_v52 = vadd.f32 %v3722_v38, %v663_v43  ;;  %v737_v53 = vadd.f32 %v3738_v46, %v663_v43  ;;  %v808_v0 = vadd.f32 %v3740_v47, %v663_v43 }
 0x139   :  { %v1371_v38 = vrot.slane %v3815_v61, %v3730_v42  ;;  %v652_v46 = vadd.f32 %v648_v36, %v467_v62  ;;  %v654_v47 = vadd.f32 %v650_v60, %v469_v63 }
 0x13a   :  { %v833_v25 = vmul.f32 %v816_v7, %v735_v51  ;;  %v835_v27 = vmul.f32 %v824_v8, %v806_v52  ;;  %v834_v44 = vmul.f32 %v820_v12, %v737_v53  ;;  %v836_v45 = vmul.f32 %v828_v13, %v808_v0 }
 0x13b   :  { %v1556_v7 = vrot.slane %v3830_v2, %v3730_v42  ;;  %v1564_v8 = vrot.slane %v3830_v2, %v3726_v40  ;;  %v1568_v13 = vrot.slane %v3830_v2, %v3728_v41 }
 0x13c   :  { %v837_v12 = vadd.f32 %v833_v25, %v652_v46  ;;  %v839_v52 = vadd.f32 %v835_v27, %v654_v47  ;;  %v838_v62 = vadd.f32 %v834_v44, %v653_v26  ;;  %v840_v63 = vadd.f32 %v836_v45, %v655_v29  ;;  %v2701_v47 = vld [vmem:[%s4078_s3 + $0x20] sm:$0xf] }
 0x14d   :  { %v3756_v57 = vpop.f32.mrf.mxu0 }
 0x14e   :  { %v3758_v58 = vpop.f32.mrf.mxu1 }
 0x14f   :  { %v3785_v14 = vpop.f32.mrf.mxu0 }
 0x150   :  { %v3787_v15 = vpop.f32.mrf.mxu1 }
 0x154   :  { %v848_v37 = vpop.permute.xlu0 %847 }
 0x155   :  { %v920_v30 = vadd.f32 %v3756_v57, %v848_v37  ;;  %v991_v31 = vadd.f32 %v3758_v58, %v848_v37  ;;  %v922_v57 = vadd.f32 %v3785_v14, %v848_v37  ;;  %v993_v58 = vadd.f32 %v3787_v15, %v848_v37 }
 0x157   :  { %v1018_v61 = vmul.f32 %v1001_v18, %v920_v30  ;;  %v1020_v14 = vmul.f32 %v1009_v19, %v991_v31  ;;  %v1019_v16 = vmul.f32 %v1005_v20, %v922_v57  ;;  %v1021_v54 = vmul.f32 %v1013_v21, %v993_v58 }
 0x159   :  { %v1022_v37 = vadd.f32 %v1018_v61, %v837_v12  ;;  %v1024_v20 = vadd.f32 %v1020_v14, %v839_v52  ;;  %v1023_v25 = vadd.f32 %v1019_v16, %v838_v62  ;;  %v1025_v27 = vadd.f32 %v1021_v54, %v840_v63 }
 0x16a   :  { %v1104_v22 = vpop.f32.mrf.mxu0 }
 0x16b   :  { %v1175_v24 = vpop.f32.mrf.mxu1 }
 0x16c   :  { %v1106_v33 = vpop.f32.mrf.mxu0 }
 0x16d   :  { %v1177_v4 = vpop.f32.mrf.mxu1 }
 0x170   :  { %v1033_v23 = vpop.permute.xlu1 %1032 }
 0x171   :  { %v1105_v59 = vadd.f32 %v1104_v22, %v1033_v23  ;;  %v1176_v36 = vadd.f32 %v1175_v24, %v1033_v23  ;;  %v1107_v15 = vadd.f32 %v1106_v33, %v1033_v23  ;;  %v1178_v22 = vadd.f32 %v1177_v4, %v1033_v23 }
 0x173   :  { %v1203_v18 = vmul.f32 %v1186_v49, %v1105_v59  ;;  %v1205_v19 = vmul.f32 %v1194_v32, %v1176_v36  ;;  %v1204_v9 = vmul.f32 %v1190_v50, %v1107_v15  ;;  %v1206_v21 = vmul.f32 %v1198_v35, %v1178_v22 }
 0x174   :  { %v1741_v35 = vrot.slane %v2701_v47, %v3730_v42 }
 0x175   :  { %v1207_v23 = vadd.f32 %v1203_v18, %v1022_v37  ;;  %v1209_v26 = vadd.f32 %v1205_v19, %v1024_v20  ;;  %v1835_v37 = vld [vmem:[%s4080_s8] sm:$0xff] }
 0x17c   :  { %v1218_v48 = vpop.permute.xlu0 %1217  ;;  %v1403_v24 = vpop.permute.xlu1 %1402 }
 0x180   :  { %v1588_v28 = vpop.permute.xlu0 %1587  ;;  %v1770_v63 = vpop.permute.xlu1 %1769 }
 0x187   :  { %v1289_v10 = vpop.f32.mrf.mxu0  ;;  %v1360_v11 = vpop.f32.mrf.mxu1 }
 0x188   :  { %v1290_v5 = vadd.f32 %v1289_v10, %v1218_v48  ;;  %v1361_v6 = vadd.f32 %v1360_v11, %v1218_v48 }
 0x189   :  { %v1291_v34 = vpop.f32.mrf.mxu0  ;;  %v1362_v43 = vpop.f32.mrf.mxu1 }
 0x18a   :  { %v1292_v10 = vadd.f32 %v1291_v34, %v1218_v48  ;;  %v1363_v11 = vadd.f32 %v1362_v43, %v1218_v48  ;;  %v1388_v49 = vmul.f32 %v1371_v38, %v1290_v5  ;;  %v1390_v2 = vmul.f32 %v1379_v55, %v1361_v6 }
 0x18b   :  { %v1208_v34 = vadd.f32 %v1204_v9, %v1023_v25  ;;  %v1210_v43 = vadd.f32 %v1206_v21, %v1025_v27  ;;  %v1749_v38 = vrot.slane %v2701_v47, %v3726_v40 }
 0x18c   :  { %v1389_v29 = vmul.f32 %v1375_v17, %v1292_v10  ;;  %v1391_v30 = vmul.f32 %v1383_v1, %v1363_v11  ;;  %v1392_v55 = vadd.f32 %v1388_v49, %v1207_v23  ;;  %v1394_v44 = vadd.f32 %v1390_v2, %v1209_v26 }
 0x18d   :  { %v1745_v17 = vrot.slane %v2701_v47, %v3724_v39  ;;  %v1753_v1 = vrot.slane %v2701_v47, %v3728_v41 }
 0x1a3   :  { %v1474_v60 = vpop.f32.mrf.mxu0 }
 0x1a4   :  { %v1545_v51 = vpop.f32.mrf.mxu1  ;;  %v1475_v53 = vadd.f32 %v1474_v60, %v1403_v24 }
 0x1a5   :  { %v1476_v33 = vpop.f32.mrf.mxu0  ;;  %v1546_v0 = vadd.f32 %v1545_v51, %v1403_v24 }
 0x1a6   :  { %v1547_v4 = vpop.f32.mrf.mxu1  ;;  %v1477_v46 = vadd.f32 %v1476_v33, %v1403_v24  ;;  %v1573_v31 = vmul.f32 %v1556_v7, %v1475_v53  ;;  %v1393_v7 = vadd.f32 %v1389_v29, %v1208_v34 }
 0x1a7   :  { %v1548_v32 = vadd.f32 %v1547_v4, %v1403_v24  ;;  %v1575_v50 = vmul.f32 %v1564_v8, %v1546_v0  ;;  %v1395_v8 = vadd.f32 %v1391_v30, %v1210_v43  ;;  %v1810_v0 = vld [vmem:[%s4079_s5] sm:$0xf] }
 0x1a8   :  { %v1574_v45 = vmul.f32 %v1560_v56, %v1477_v46  ;;  %v1577_v60 = vadd.f32 %v1573_v31, %v1392_v55  ;;  %v1820_v43 = vld [vmem:[%s4081_s6] sm:$0xf] }
 0x1a9   :  { %v1576_v48 = vmul.f32 %v1568_v13, %v1548_v32  ;;  %v1579_v51 = vadd.f32 %v1575_v50, %v1394_v44 }
 0x1aa   :  { %v1578_v56 = vadd.f32 %v1574_v45, %v1393_v7 }
 0x1ab   :  { %v1580_v13 = vadd.f32 %v1576_v48, %v1395_v8 }
 0x1c0   :  { %v1659_v57 = vpop.f32.mrf.mxu0  ;;  %v1730_v58 = vpop.f32.mrf.mxu1 }
 0x1c1   :  { %v1660_v59 = vadd.f32 %v1659_v57, %v1588_v28  ;;  %v1731_v36 = vadd.f32 %v1730_v58, %v1588_v28 }
 0x1c2   :  { %v1661_v12 = vpop.f32.mrf.mxu0  ;;  %v1732_v42 = vpop.f32.mrf.mxu1 }
 0x1c3   :  { %v1758_v52 = vmul.f32 %v1741_v35, %v1660_v59  ;;  %v1760_v40 = vmul.f32 %v1749_v38, %v1731_v36  ;;  %v1662_v61 = vadd.f32 %v1661_v12, %v1588_v28  ;;  %v1733_v14 = vadd.f32 %v1732_v42, %v1588_v28 }
 0x1c5   :  { %v1762_v15 = vadd.f32 %v1758_v52, %v1577_v60  ;;  %v1764_v22 = vadd.f32 %v1760_v40, %v1579_v51  ;;  %v1759_v24 = vmul.f32 %v1745_v17, %v1662_v61  ;;  %v1761_v62 = vmul.f32 %v1753_v1, %v1733_v14  ;;  %v1834_v14 = vld [vmem:[%s4082_s7] sm:$0xff] }
 0x1c7   :  { %v1772_v39 = vadd.f32 %v1770_v63, %v1762_v15  ;;  %v1763_v5 = vadd.f32 %v1759_v24, %v1578_v56  ;;  %v1765_v41 = vadd.f32 %v1761_v62, %v1580_v13  ;;  %v1774_v16 = vadd.f32 %v1770_v63, %v1764_v22  ;;  %v2708_v56 = vld [vmem:[%s4082_s7 + $0x8] sm:$0xff]  ;;  %v2715_v13 = vld [vmem:[%s4082_s7 + $0x10] sm:$0xff]  ;;  %v2722_v15 = vld [vmem:[%s4082_s7 + $0x18] sm:$0xff] }
 0x1c9   :  { %v1773_v6 = vadd.f32 %v1770_v63, %v1763_v5  ;;  %v1775_v54 = vadd.f32 %v1770_v63, %v1765_v41  ;;  %v1776_v18 = vsel %vm101_vm0, %v1772_v39, 0.0  ;;  %v1779_v4 = vsel %vm101_vm0, %v1774_v16, 0.0 }
 0x1cb   :  { %v1777_v19 = vsel %vm101_vm0, %v1773_v6, 0.0  ;;  %v1781_v11 = vsel %vm101_vm0, %v1775_v54, 0.0 }
 0x1cc   :  { %v1778_v33 = vadd.f32 %v1777_v19, %v1776_v18 }
 0x1ce   :  { %v1780_v10 = vadd.f32 %v1779_v4, %v1778_v33 }
 0x1d0   :  { %v1782_v53 = vadd.f32 %v1781_v11, %v1780_v10 }
 0x1d2   :  { %1783 = vadd.xlane.f32.xlu0 %v1782_v53 }
 0x1e8   :  { %1813 = vperm.xlu0 %2743, %v1810_v0  }
 0x1ec   :  { %1838 = vperm.xlu0 %2743, %v1835_v37  }
 0x25b   :  { %v1784_v20 = vpop.xlane.xlu0 %1783 }
 0x25c   :  { %v1785_v9 = vmul.f32 0.001953125, %v1784_v20 }
 0x25e   :  { %v1786_v21 = vsub.f32 %v1772_v39, %v1785_v9  ;;  %v1787_v49 = vsub.f32 %v1773_v6, %v1785_v9  ;;  %v1788_v2 = vsub.f32 %v1774_v16, %v1785_v9  ;;  %v1789_v46 = vsub.f32 %v1775_v54, %v1785_v9 }
 0x260   :  { %v1790_v32 = vmul.f32 %v1786_v21, %v1786_v21  ;;  %v1791_v47 = vmul.f32 %v1787_v49, %v1787_v49  ;;  %v1792_v25 = vmul.f32 %v1788_v2, %v1788_v2  ;;  %v1793_v27 = vmul.f32 %v1789_v46, %v1789_v46 }
 0x262   :  { %v1794_v23 = vsel %vm101_vm0, %v1790_v32, 0.0  ;;  %v1795_v26 = vsel %vm101_vm0, %v1791_v47, 0.0  ;;  %v1797_v30 = vsel %vm101_vm0, %v1792_v25, 0.0  ;;  %v1799_v50 = vsel %vm101_vm0, %v1793_v27, 0.0 }
 0x263   :  { %v1796_v29 = vadd.f32 %v1795_v26, %v1794_v23  ;;  %v1814_v58 = vpop.permute.xlu0 %1813 }
 0x265   :  { %v1798_v31 = vadd.f32 %v1797_v30, %v1796_v29 }
 0x267   :  { %v1800_v34 = vadd.f32 %v1799_v50, %v1798_v31  ;;  %v1839_v62 = vpop.permute.xlu0 %1838 }
 0x269   :  { %1801 = vadd.xlane.f32.xlu1 %v1800_v34 }
 0x27a   :  { %1823 = vperm.xlu1 %2744, %v1820_v43  }
 0x2f2   :  { %v1802_v28 = vpop.xlane.xlu1 %1801 }
 0x2f3   :  { %v1803_v35 = vmul.f32 0.001953125, %v1802_v28 }
 0x2f5   :  { %v1804_v38 = vadd.f32 1e-05, %v1803_v35 }
 0x2f6   :  { %v1824_v7 = vpop.permute.xlu1 %1823 }
 0x2f7   :  { %2745 = vrsqrt.f32 %v1804_v38 }
 0x304   :  { %v2746_v55 = vpop.eup %2745 }
 0x305   :  { %v1806_v44 = vmul.f32 %v2746_v55, %v1786_v21  ;;  %v1807_v45 = vmul.f32 %v2746_v55, %v1787_v49  ;;  %v1808_v48 = vmul.f32 %v2746_v55, %v1788_v2  ;;  %v1809_v57 = vmul.f32 %v2746_v55, %v1789_v46 }
 0x307   :  { %v1816_v59 = vmul.f32 %v1814_v58, %v1806_v44  ;;  %v1817_v36 = vmul.f32 %v1814_v58, %v1807_v45  ;;  %v1818_v17 = vmul.f32 %v1814_v58, %v1808_v48  ;;  %v1819_v1 = vmul.f32 %v1814_v58, %v1809_v57 }
 0x309   :  { %v1826_v8 = vadd.f32 %v1824_v7, %v1816_v59  ;;  %v1827_v60 = vadd.f32 %v1824_v7, %v1817_v36  ;;  %v1828_v51 = vadd.f32 %v1824_v7, %v1818_v17  ;;  %v1829_v12 = vadd.f32 %v1824_v7, %v1819_v1 }
 0x30b   :  { %v1830_v42 = vmax.f32 %v1826_v8, 0.0  ;;  %v1831_v52 = vmax.f32 %v1827_v60, 0.0  ;;  %v1832_v40 = vmax.f32 %v1828_v51, 0.0  ;;  %v1833_v61 = vmax.f32 %v1829_v12, 0.0 }
 0x30d   :  { %2702 = vmatprep.subr.msk.mxu0 %vm101_vm0, %v1831_v52  ;;  %2705 = vmatprep.subr.msk.mxu1 %vm101_vm0, %v1833_v61 }
 0x30e   :  { %2703 = vmatpush1.msk.msra.mxu0 %vm101_vm0, %v1830_v42  ;;  %2706 = vmatpush1.msk.msra.mxu1 %vm101_vm0, %v1832_v40 }
 0x30f   :  { %2704 = vmatmul.mubr.msk.f32.vlgmr.msra.gmra.mxu0 %vm1841_vm2, %v1834_v14  ;;  %2707 = vmatmul.mubr.msk.f32.vlgmr.msra.gmra.mxu1 %vm1841_vm2, %v1834_v14 }
 0x310   :  { %2709 = vmatprep.subr.msk.mxu0 %vm101_vm0, %v1831_v52  ;;  %2712 = vmatprep.subr.msk.mxu1 %vm101_vm0, %v1833_v61 }
 0x311   :  { %2710 = vmatpush1.msk.msra.mxu0 %vm101_vm0, %v1830_v42  ;;  %2713 = vmatpush1.msk.msra.mxu1 %vm101_vm0, %v1832_v40 }
 0x312   :  { %2716 = vmatprep.subr.msk.mxu0 %vm101_vm0, %v1831_v52  ;;  %2719 = vmatprep.subr.msk.mxu1 %vm101_vm0, %v1833_v61 }
 0x313   :  { %2068 = vmatprep.mubr.f32.mxu0 %v2765_v3  ;;  %2139 = vmatprep.mubr.f32.mxu1 %v2765_v3 }
 0x314   :  { %2711 = vmatmul.mubr.msk.f32.vlgmr.msra.gmra.mxu0 %vm1841_vm2, %v2708_v56  ;;  %2714 = vmatmul.mubr.msk.f32.vlgmr.msra.gmra.mxu1 %vm1841_vm2, %v2708_v56 }
 0x315   :  { %2717 = vmatpush1.msk.msra.mxu0 %vm101_vm0, %v1830_v42  ;;  %2720 = vmatpush1.msk.msra.mxu1 %vm101_vm0, %v1832_v40 }
 0x316   :  { %2723 = vmatprep.subr.msk.mxu0 %vm101_vm0, %v1831_v52  ;;  %2726 = vmatprep.subr.msk.mxu1 %vm101_vm0, %v1833_v61 }
 0x317   :  { %2215 = vmatprep.mubr.f32.mxu0 %v2765_v3  ;;  %2286 = vmatprep.mubr.f32.mxu1 %v2765_v3 }
 0x318   :  { %2718 = vmatmul.mubr.msk.f32.vlgmr.msra.gmra.mxu0 %vm1841_vm2, %v2715_v13  ;;  %2721 = vmatmul.mubr.msk.f32.vlgmr.msra.gmra.mxu1 %vm1841_vm2, %v2715_v13 }
 0x319   :  { %2724 = vmatpush1.msk.msra.mxu0 %vm101_vm0, %v1830_v42  ;;  %2727 = vmatpush1.msk.msra.mxu1 %vm101_vm0, %v1832_v40 }
 0x31a   :  { %2362 = vmatprep.mubr.f32.mxu0 %v2765_v3  ;;  %2433 = vmatprep.mubr.f32.mxu1 %v2765_v3 }
 0x31c   :  { %2725 = vmatmul.mubr.msk.f32.vlgmr.msra.gmra.mxu0 %vm1841_vm2, %v2722_v15  ;;  %2728 = vmatmul.mubr.msk.f32.vlgmr.msra.gmra.mxu1 %vm1841_vm2, %v2722_v15 }
 0x3cf   :  { %v1923_v22 = vpop.f32.mrf.mxu0  ;;  %v1994_v24 = vpop.f32.mrf.mxu1 }
 0x3d0   :  { %v1924_v5 = vadd.f32 %v1923_v22, %v1839_v62  ;;  %v1995_v6 = vadd.f32 %v1994_v24, %v1839_v62 }
 0x3d1   :  { %v1925_v63 = vpop.f32.mrf.mxu0  ;;  %v1996_v39 = vpop.f32.mrf.mxu1 }
 0x3d2   :  { %v1926_v41 = vadd.f32 %v1925_v63, %v1839_v62  ;;  %v1997_v19 = vadd.f32 %v1996_v39, %v1839_v62 }
 0x3d4   :  { %v2440_v16 = vadd.f32 %v1926_v41, %v1924_v5  ;;  %v2070_v54 = vpop.f32.mrf.mxu0  ;;  %v2141_v18 = vpop.f32.mrf.mxu1 }
 0x3d5   :  { %v2071_v3 = vadd.f32 %v2070_v54, %v1839_v62  ;;  %v2142_v20 = vadd.f32 %v2141_v18, %v1839_v62 }
 0x3d6   :  { %v2072_v33 = vpop.f32.mrf.mxu0  ;;  %v2143_v4 = vpop.f32.mrf.mxu1  ;;  %v2441_v10 = vadd.f32 %v2440_v16, %v1995_v6 }
 0x3d7   :  { %v2073_v11 = vadd.f32 %v2072_v33, %v1839_v62  ;;  %v2144_v2 = vadd.f32 %v2143_v4, %v1839_v62 }
 0x3d8   :  { %v2217_v53 = vpop.f32.mrf.mxu0  ;;  %v2288_v0 = vpop.f32.mrf.mxu1  ;;  %v2442_v37 = vadd.f32 %v2441_v10, %v1997_v19 }
 0x3d9   :  { %v2445_v9 = vadd.f32 %v2073_v11, %v2071_v3  ;;  %v2218_v46 = vadd.f32 %v2217_v53, %v1839_v62  ;;  %v2289_v23 = vadd.f32 %v2288_v0, %v1839_v62 }
 0x3da   :  { %v2219_v21 = vpop.f32.mrf.mxu0  ;;  %v2290_v49 = vpop.f32.mrf.mxu1  ;;  %2443 = vadd.xlane.f32.xlu1 %v2442_v37 }
 0x3db   :  { %v2220_v32 = vadd.f32 %v2219_v21, %v1839_v62  ;;  %v2446_v47 = vadd.f32 %v2445_v9, %v2142_v20  ;;  %v2291_v31 = vadd.f32 %v2290_v49, %v1839_v62 }
 0x3dc   :  { %v2364_v25 = vpop.f32.mrf.mxu0  ;;  %v2435_v27 = vpop.f32.mrf.mxu1 }
 0x3dd   :  { %v2451_v26 = vadd.f32 %v2220_v32, %v2218_v46  ;;  %v2447_v29 = vadd.f32 %v2446_v47, %v2144_v2  ;;  %v2365_v50 = vadd.f32 %v2364_v25, %v1839_v62  ;;  %v2436_v35 = vadd.f32 %v2435_v27, %v1839_v62 }
 0x3de   :  { %v2366_v30 = vpop.f32.mrf.mxu0  ;;  %v2437_v28 = vpop.f32.mrf.mxu1 }
 0x3df   :  { %v2367_v34 = vadd.f32 %v2366_v30, %v1839_v62  ;;  %2448 = vadd.xlane.f32.xlu0 %v2447_v29  ;;  %v2452_v43 = vadd.f32 %v2451_v26, %v2289_v23  ;;  %v2438_v44 = vadd.f32 %v2437_v28, %v1839_v62  ;;  %v2533_v30 = vld [vmem:[%s4083_s10] sm:$0xff] }
 0x3e1   :  { %v2457_v38 = vadd.f32 %v2367_v34, %v2365_v50  ;;  %v2453_v55 = vadd.f32 %v2452_v43, %v2291_v31 }
 0x3e3   :  { %2454 = vadd.xlane.f32.xlu0 %v2453_v55  ;;  %v2458_v45 = vadd.f32 %v2457_v38, %v2436_v35 }
 0x3e5   :  { %v2459_v48 = vadd.f32 %v2458_v45, %v2438_v44  ;;  %v2522_v45 = vld [vmem:[%s4084_s9] sm:$0xff] }
 0x3e7   :  { %2460 = vadd.xlane.f32.xlu1 %v2459_v48 }
 0x463   :  { %v2444_v58 = vpop.xlane.xlu1 %2443 }
 0x468   :  { %v2449_v57 = vpop.xlane.xlu0 %2448 }
 0x469   :  { %v2450_v36 = vadd.f32 %v2449_v57, %v2444_v58 }
 0x46c   :  { %v2455_v59 = vpop.xlane.xlu0 %2454 }
 0x46d   :  { %v2456_v17 = vadd.f32 %v2455_v59, %v2450_v36 }
 0x470   :  { %v2461_v1 = vpop.xlane.xlu1 %2460 }
 0x471   :  { %v2462_v7 = vadd.f32 %v2461_v1, %v2456_v17 }
 0x473   :  { %v2463_v8 = vmul.f32 0.00048828125, %v2462_v7 }
 0x475   :  { %v3940_v60 = vsub.f32 %v2071_v3, %v2463_v8  ;;  %v3942_v51 = vsub.f32 %v2073_v11, %v2463_v8  ;;  %v3944_v12 = vsub.f32 %v2142_v20, %v2463_v8  ;;  %v3946_v42 = vsub.f32 %v2144_v2, %v2463_v8 }
 0x476   :  { %v3948_v52 = vsub.f32 %v1924_v5, %v2463_v8  ;;  %v3950_v40 = vsub.f32 %v1926_v41, %v2463_v8  ;;  %v3952_v61 = vsub.f32 %v1995_v6, %v2463_v8  ;;  %v3954_v14 = vsub.f32 %v1997_v19, %v2463_v8 }
 0x477   :  { %v2489_v56 = vmul.f32 %v3940_v60, %v3940_v60  ;;  %v2490_v13 = vmul.f32 %v3942_v51, %v3942_v51  ;;  %v2491_v15 = vmul.f32 %v3944_v12, %v3944_v12  ;;  %v2492_v22 = vmul.f32 %v3946_v42, %v3946_v42 }
 0x478   :  { %v2480_v24 = vmul.f32 %v3948_v52, %v3948_v52  ;;  %v2481_v62 = vmul.f32 %v3950_v40, %v3950_v40  ;;  %v2482_v63 = vmul.f32 %v3952_v61, %v3952_v61  ;;  %v3970_v5 = vsub.f32 %v2365_v50, %v2463_v8 }
 0x479   :  { %v2493_v39 = vadd.f32 %v2490_v13, %v2489_v56  ;;  %v3972_v41 = vsub.f32 %v2367_v34, %v2463_v8  ;;  %v3974_v6 = vsub.f32 %v2436_v35, %v2463_v8  ;;  %v2483_v16 = vmul.f32 %v3954_v14, %v3954_v14 }
 0x47a   :  { %v2484_v54 = vadd.f32 %v2481_v62, %v2480_v24  ;;  %v3978_v18 = vsub.f32 %v2218_v46, %v2463_v8  ;;  %v3980_v19 = vsub.f32 %v2220_v32, %v2463_v8  ;;  %v3982_v4 = vsub.f32 %v2438_v44, %v2463_v8 }
 0x47b   :  { %v2494_v33 = vadd.f32 %v2493_v39, %v2491_v15  ;;  %v2509_v10 = vmul.f32 %v3970_v5, %v3970_v5  ;;  %v2510_v3 = vmul.f32 %v3972_v41, %v3972_v41  ;;  %v2511_v53 = vmul.f32 %v3974_v6, %v3974_v6 }
 0x47c   :  { %v2485_v11 = vadd.f32 %v2484_v54, %v2482_v63  ;;  %v3990_v0 = vsub.f32 %v2289_v23, %v2463_v8  ;;  %v3992_v37 = vsub.f32 %v2291_v31, %v2463_v8  ;;  %v2499_v21 = vmul.f32 %v3978_v18, %v3978_v18 }
 0x47d   :  { %v2495_v20 = vadd.f32 %v2494_v33, %v2492_v22  ;;  %v2513_v9 = vadd.f32 %v2510_v3, %v2509_v10  ;;  %v2500_v49 = vmul.f32 %v3980_v19, %v3980_v19  ;;  %v2512_v46 = vmul.f32 %v3982_v4, %v3982_v4 }
 0x47e   :  { %v2486_v2 = vadd.f32 %v2485_v11, %v2483_v16  ;;  %v2501_v47 = vmul.f32 %v3990_v0, %v3990_v0  ;;  %v2502_v23 = vmul.f32 %v3992_v37, %v3992_v37 }
 0x47f   :  { %2496 = vadd.xlane.f32.xlu1 %v2495_v20  ;;  %v2514_v32 = vadd.f32 %v2513_v9, %v2511_v53  ;;  %v2503_v25 = vadd.f32 %v2500_v49, %v2499_v21 }
 0x480   :  { %2487 = vadd.xlane.f32.xlu0 %v2486_v2 }
 0x481   :  { %v2515_v27 = vadd.f32 %v2514_v32, %v2512_v46  ;;  %v2504_v26 = vadd.f32 %v2503_v25, %v2501_v47 }
 0x483   :  { %2516 = vadd.xlane.f32.xlu1 %v2515_v27  ;;  %v2505_v29 = vadd.f32 %v2504_v26, %v2502_v23 }
 0x485   :  { %2506 = vadd.xlane.f32.xlu0 %v2505_v29 }
 0x494   :  { %2536 = vperm.xlu1 %2744, %v2533_v30  }
 0x498   :  { %2558 = vperm.xlu1 %2744, %v2533_v30  }
 0x49c   :  { %2604 = vperm.xlu1 %2744, %v2533_v30  }
 0x508   :  { %v2497_v50 = vpop.xlane.xlu1 %2496 }
 0x509   :  { %v2488_v31 = vpop.xlane.xlu0 %2487 }
 0x50a   :  { %v2498_v34 = vadd.f32 %v2497_v50, %v2488_v31 }
 0x50c   :  { %v2517_v35 = vpop.xlane.xlu1 %2516 }
 0x50e   :  { %v2507_v43 = vpop.xlane.xlu0 %2506 }
 0x50f   :  { %v2508_v28 = vadd.f32 %v2507_v43, %v2498_v34 }
 0x510   :  { %v2537_v58 = vpop.permute.xlu1 %2536 }
 0x511   :  { %v2518_v38 = vadd.f32 %v2517_v35, %v2508_v28 }
 0x513   :  { %v2519_v55 = vmul.f32 0.00048828125, %v2518_v38 }
 0x514   :  { %v2559_v8 = vpop.permute.xlu1 %2558 }
 0x515   :  { %v2520_v44 = vadd.f32 1e-05, %v2519_v55 }
 0x517   :  { %2747 = vrsqrt.f32 %v2520_v44 }
 0x524   :  { %v2748_v48 = vpop.eup %2747 }
 0x525   :  { %v2523_v57 = vmul.f32 %v2748_v48, %v2522_v45 }
 0x527   :  { %2526 = vperm.xlu0 %2743, %v2523_v57  }
 0x52b   :  { %2581 = vperm.xlu0 %2743, %v2533_v30  }
 0x5a2   :  { %v2527_v59 = vpop.permute.xlu0 %2526 }
 0x5a3   :  { %v2529_v36 = vmul.f32 %v2527_v59, %v3948_v52  ;;  %v2530_v17 = vmul.f32 %v2527_v59, %v3950_v40  ;;  %v2531_v1 = vmul.f32 %v2527_v59, %v3952_v61  ;;  %v2532_v7 = vmul.f32 %v2527_v59, %v3954_v14 }
 0x5a4   :  { %v2551_v56 = vmul.f32 %v2527_v59, %v3940_v60  ;;  %v2552_v13 = vmul.f32 %v2527_v59, %v3942_v51  ;;  %v2553_v15 = vmul.f32 %v2527_v59, %v3944_v12  ;;  %v2554_v22 = vmul.f32 %v2527_v59, %v3946_v42 }
 0x5a5   :  { %v2539_v24 = vadd.f32 %v2537_v58, %v2529_v36  ;;  %v2540_v62 = vadd.f32 %v2537_v58, %v2530_v17  ;;  %v2541_v63 = vadd.f32 %v2537_v58, %v2531_v1  ;;  %v2542_v39 = vadd.f32 %v2537_v58, %v2532_v7 }
 0x5a6   :  { %v2561_v52 = vadd.f32 %v2559_v8, %v2551_v56  ;;  %v2562_v16 = vadd.f32 %v2559_v8, %v2552_v13  ;;  %v2563_v40 = vadd.f32 %v2559_v8, %v2553_v15  ;;  %v2564_v54 = vadd.f32 %v2559_v8, %v2554_v22 }
 0x5a7   :  { %v2543_v61 = vmax.f32 %v2539_v24, 0.0  ;;  %v2544_v33 = vmax.f32 %v2540_v62, 0.0  ;;  %v2545_v14 = vmax.f32 %v2541_v63, 0.0  ;;  %v2546_v10 = vmax.f32 %v2542_v39, 0.0 }
 0x5a8   :  { %v2565_v3 = vmax.f32 %v2561_v52, 0.0  ;;  %v2566_v60 = vmax.f32 %v2562_v16, 0.0  ;;  %v2567_v11 = vmax.f32 %v2563_v40, 0.0  ;;  %v2568_v51 = vmax.f32 %v2564_v54, 0.0 }
 0x5a9   :  { %v2597_v12 = vmul.f32 %v2527_v59, %v3970_v5  ;;  %v2598_v42 = vmul.f32 %v2527_v59, %v3972_v41  ;;  %v2599_v53 = vmul.f32 %v2527_v59, %v3974_v6  ;;  %v2600_v20 = vmul.f32 %v2527_v59, %v3982_v4  ;;  %2547 = vst [vmem:[%s4085_s11] sm:$0xff] %v2543_v61  ;;  %v2582_v5 = vpop.permute.xlu0 %2581  ;;  %v2605_v41 = vpop.permute.xlu1 %2604 }
 0x5aa   :  { %2548 = vst [vmem:[%s4085_s11 + $0x8] sm:$0xff] %v2544_v33  ;;  %2549 = vst [vmem:[%s4085_s11 + $0x10] sm:$0xff] %v2545_v14  ;;  %v2574_v6 = vmul.f32 %v2527_v59, %v3978_v18  ;;  %v2575_v4 = vmul.f32 %v2527_v59, %v3980_v19  ;;  %v2576_v9 = vmul.f32 %v2527_v59, %v3990_v0 }
 0x5ab   :  { %2550 = vst [vmem:[%s4085_s11 + $0x18] sm:$0xff] %v2546_v10  ;;  %2729 = vst [vmem:[%s4085_s11 + $0x20] sm:$0xff] %v2565_v3  ;;  %v2577_v21 = vmul.f32 %v2527_v59, %v3992_v37  ;;  %v2607_v49 = vadd.f32 %v2605_v41, %v2597_v12  ;;  %v2608_v2 = vadd.f32 %v2605_v41, %v2598_v42 }
 0x5ac   :  { %2730 = vst [vmem:[%s4085_s11 + $0x28] sm:$0xff] %v2566_v60  ;;  %2731 = vst [vmem:[%s4085_s11 + $0x30] sm:$0xff] %v2567_v11  ;;  %v2609_v46 = vadd.f32 %v2605_v41, %v2599_v53  ;;  %v2610_v32 = vadd.f32 %v2605_v41, %v2600_v20  ;;  %v2584_v47 = vadd.f32 %v2582_v5, %v2574_v6 }
 0x5ad   :  { %2732 = vst [vmem:[%s4085_s11 + $0x38] sm:$0xff] %v2568_v51  ;;  %v2585_v25 = vadd.f32 %v2582_v5, %v2575_v4  ;;  %v2586_v27 = vadd.f32 %v2582_v5, %v2576_v9  ;;  %v2587_v23 = vadd.f32 %v2582_v5, %v2577_v21  ;;  %v2611_v26 = vmax.f32 %v2607_v49, 0.0 }
 0x5ae   :  { %v2612_v29 = vmax.f32 %v2608_v2, 0.0  ;;  %v2613_v30 = vmax.f32 %v2609_v46, 0.0  ;;  %v2614_v31 = vmax.f32 %v2610_v32, 0.0  ;;  %v2588_v50 = vmax.f32 %v2584_v47, 0.0 }
 0x5af   :  { %v2589_v18 = vmax.f32 %v2585_v25, 0.0  ;;  %v2590_v34 = vmax.f32 %v2586_v27, 0.0  ;;  %v2591_v19 = vmax.f32 %v2587_v23, 0.0  ;;  %2737 = vst [vmem:[%s4085_s11 + $0x60] sm:$0xff] %v2611_v26 }
 0x5b0   :  { %2738 = vst [vmem:[%s4085_s11 + $0x68] sm:$0xff] %v2612_v29  ;;  %2739 = vst [vmem:[%s4085_s11 + $0x70] sm:$0xff] %v2613_v30 }
 0x5b1   :  { %2740 = vst [vmem:[%s4085_s11 + $0x78] sm:$0xff] %v2614_v31  ;;  %2733 = vst [vmem:[%s4085_s11 + $0x40] sm:$0xff] %v2588_v50 }
 0x5b2   :  { %2734 = vst [vmem:[%s4085_s11 + $0x48] sm:$0xff] %v2589_v18  ;;  %2735 = vst [vmem:[%s4085_s11 + $0x50] sm:$0xff] %v2590_v34 }
 0x5b3   :  { %2736 = vst [vmem:[%s4085_s11 + $0x58] sm:$0xff] %v2591_v19 }

</bundles_post_ra>
